<compile_context>
chip_gen: v7x
topology: tpu7x:2x2x1
jax: 0.10.0
libtpu: 0.0.40
codegen_flags: <defaults>
</compile_context>

<pallas_src>
import math

import jax
import jax.numpy as jnp
from jax.experimental import pallas as pl
from jax.experimental.pallas import tpu as pltpu

FEATURE_DIM = 128
HIDDEN_DIM = 64
EMBED_DIM = FEATURE_DIM + HIDDEN_DIM   # 192
NUM_HEADS = 8
HEAD_DIM = EMBED_DIM // NUM_HEADS      # 24
NUM_POSITIONS = 1000


def _inter_line_kernel(feat_ref, pos_ref, wf_ref, wh_ref, bqkv_ref,
                       wo_ref, bo_ref, wout_ref, bout_ref, out_ref):
    """Fused MHA + output projection for one batch block.

    feat_ref : (Bt, S, 128) bf16   line features
    pos_ref  : (Bt, S, 64)  bf16   gathered position embeddings
    wf_ref   : (3, 128, 192) bf16  Q/K/V weight rows hitting the features   (scale folded into Q)
    wh_ref   : (3, 64, 192)  bf16  Q/K/V weight rows hitting the pos-emb    (scale folded into Q)
    bqkv_ref : (3, 1, 192)   f32   Q/K/V biases (scale folded into Q)
    wo_ref   : (8, 24, 192)  bf16  per-head slabs of out_proj.weight.T
    bo_ref   : (1, 192)      f32   out_proj.bias
    wout_ref : (192, 128)    bf16  output_projection.weight.T
    bout_ref : (1, 128)      f32   output_projection.bias
    out_ref  : (Bt, S, 128)  f32
    """
    bt, s, fdim = feat_ref.shape
    m = bt * s

    feat2 = feat_ref[...].reshape(m, fdim)            # (M, 128) bf16
    pos2 = pos_ref[...].reshape(m, HIDDEN_DIM)        # (M, 64)  bf16

    def in_proj(i):
        # split-K projection: the concatenated (M, 192) input is never built.
        r = jnp.dot(feat2, wf_ref[i], preferred_element_type=jnp.float32)
        r = r + jnp.dot(pos2, wh_ref[i], preferred_element_type=jnp.float32)
        return r + bqkv_ref[i]                        # (M, 192) f32

    q = in_proj(0)                                    # 1/sqrt(head_dim) already folded in
    k = in_proj(1)
    v = in_proj(2)

    q3 = q.astype(jnp.bfloat16).reshape(bt, s, EMBED_DIM)
    k3 = k.astype(jnp.bfloat16).reshape(bt, s, EMBED_DIM)
    v3 = v.astype(jnp.bfloat16).reshape(bt, s, EMBED_DIM)

    acc = None
    for h in range(NUM_HEADS):                        # static unroll over heads
        lo = h * HEAD_DIM
        qh = q3[:, :, lo:lo + HEAD_DIM]               # (Bt, S, 24) bf16
        kh = k3[:, :, lo:lo + HEAD_DIM]
        vh = v3[:, :, lo:lo + HEAD_DIM]

        # Explicit contraction on the last dims: no materialised (24, S) transpose.
        sc = jnp.einsum("bqd,bkd->bqk", qh, kh,
                        preferred_element_type=jnp.float32)            # (Bt, S, S) f32
        sc = sc - jnp.max(sc, axis=-1, keepdims=True)                  # stable softmax
        p = jnp.exp(sc)
        p = p * pl.reciprocal(jnp.sum(p, axis=-1, keepdims=True), approx=True)

        ah = jnp.einsum("bqk,bkd->bqd", p.astype(jnp.bfloat16), vh,
                        preferred_element_type=jnp.float32)            # (Bt, S, 24) f32

        # Fused MHA out-projection: per-head Wo slab, no head concat, no separate attn @ Wo.
        contrib = jnp.dot(ah.reshape(m, HEAD_DIM).astype(jnp.bfloat16), wo_ref[h],
                          preferred_element_type=jnp.float32)          # (M, 192) f32
        acc = contrib if acc is None else acc + contrib

    o = acc + bo_ref[...]                                              # (M, 192) f32
    y = jnp.dot(o.astype(jnp.bfloat16), wout_ref[...],
                preferred_element_type=jnp.float32) + bout_ref[...]    # (M, 128) f32
    out_ref[...] = y.reshape(bt, s, FEATURE_DIM)


def _pick_batch_tile(batch, seq, target_rows=256):
    """Largest divisor of `batch` such that bt*seq is near target_rows (fills MXU rows)."""
    bt = max(1, min(batch, max(1, target_rows // max(seq, 1))))
    while batch % bt:
        bt -= 1
    return bt


def inter_line_relationship(line_features, line_positions, params):
    """Forward pass equivalent to InterLineRelationship.forward (inference)."""
    B, S, F = line_features.shape
    assert F == FEATURE_DIM

    # Embedding gather stays in plain JAX; the (B, S, 192) concat is never materialised.
    pos_emb = jnp.take(params["pos_embedding"], line_positions, axis=0)      # (B, S, 64)
    feat = line_features.astype(jnp.bfloat16)
    pos = pos_emb.astype(jnp.bfloat16)

    inv_scale = 1.0 / math.sqrt(HEAD_DIM)
    w_in = params["in_proj_weight"]                                          # (3E, E)
    b_in = params["in_proj_bias"]                                            # (3E,)
    wq = w_in[:EMBED_DIM].T * inv_scale                                      # fold softmax scale
    wk = w_in[EMBED_DIM:2 * EMBED_DIM].T
    wv = w_in[2 * EMBED_DIM:].T
    bq = b_in[:EMBED_DIM] * inv_scale
    bk = b_in[EMBED_DIM:2 * EMBED_DIM]
    bv = b_in[2 * EMBED_DIM:]

    # split-K: rows [:128] multiply the line features, rows [128:] multiply the pos-embedding.
    w_feat = jnp.stack([wq[:FEATURE_DIM], wk[:FEATURE_DIM], wv[:FEATURE_DIM]]).astype(jnp.bfloat16)
    w_hid = jnp.stack([wq[FEATURE_DIM:], wk[FEATURE_DIM:], wv[FEATURE_DIM:]]).astype(jnp.bfloat16)
    b_qkv = jnp.stack([bq, bk, bv])[:, None, :].astype(jnp.float32)          # (3, 1, 192)

    # Per-head slabs of the MHA out-projection (fused into the head loop in the kernel).
    wo_heads = params["out_proj_weight"].T.reshape(
        NUM_HEADS, HEAD_DIM, EMBED_DIM).astype(jnp.bfloat16)                 # (8, 24, 192)
    bo = params["out_proj_bias"][None, :].astype(jnp.float32)                # (1, 192)

    w_out = params["output_proj_weight"].T.astype(jnp.bfloat16)              # (192, 128)
    b_out = params["output_proj_bias"][None, :].astype(jnp.float32)          # (1, 128)

    bt = _pick_batch_tile(B, S)
    grid = (B // bt,)

    # TODO(synk): for long sequences (S >~ 1k) add a query-tile grid axis with online softmax
    # (flash-style) so the (S, S) score matrices never exceed v7x's 64 MiB VMEM.
    return pl.pallas_call(
        _inter_line_kernel,
        out_shape=jax.ShapeDtypeStruct((B, S, FEATURE_DIM), jnp.float32),
        grid=grid,
        in_specs=[
            pl.BlockSpec((bt, S, FEATURE_DIM), lambda b: (b, 0, 0)),
            pl.BlockSpec((bt, S, HIDDEN_DIM), lambda b: (b, 0, 0)),
            pl.BlockSpec((3, FEATURE_DIM, EMBED_DIM), lambda b: (0, 0, 0)),
            pl.BlockSpec((3, HIDDEN_DIM, EMBED_DIM), lambda b: (0, 0, 0)),
            pl.BlockSpec((3, 1, EMBED_DIM), lambda b: (0, 0, 0)),
            pl.BlockSpec((NUM_HEADS, HEAD_DIM, EMBED_DIM), lambda b: (0, 0, 0)),
            pl.BlockSpec((1, EMBED_DIM), lambda b: (0, 0)),
            pl.BlockSpec((EMBED_DIM, FEATURE_DIM), lambda b: (0, 0)),
            pl.BlockSpec((1, FEATURE_DIM), lambda b: (0, 0)),
        ],
        out_specs=pl.BlockSpec((bt, S, FEATURE_DIM), lambda b: (b, 0, 0)),
        compiler_params=pltpu.CompilerParams(
            dimension_semantics=("parallel",),
            vmem_limit_bytes=48 * 1024 * 1024,
        ),
    )(feat, pos, w_feat, w_hid, b_qkv, wo_heads, bo, w_out, b_out)


def init_params(key):
    """Deterministic synthetic parameters matching the PyTorch module's shapes."""
    ks = jax.random.split(key, 4)
    scale = 0.02
    return {
        # nn.Embedding(1000, hidden_dim)
        "pos_embedding": scale * jax.random.normal(ks[0], (NUM_POSITIONS, HIDDEN_DIM), jnp.float32),
        # nn.MultiheadAttention in_proj (3E, E) / (3E,)
        "in_proj_weight": scale * jax.random.normal(ks[1], (3 * EMBED_DIM, EMBED_DIM), jnp.float32),
        "in_proj_bias": jnp.zeros((3 * EMBED_DIM,), jnp.float32),
        # nn.MultiheadAttention out_proj (E, E) / (E,)
        "out_proj_weight": scale * jax.random.normal(ks[2], (EMBED_DIM, EMBED_DIM), jnp.float32),
        "out_proj_bias": jnp.zeros((EMBED_DIM,), jnp.float32),
        # nn.Linear(E, feature_dim)
        "output_proj_weight": scale * jax.random.normal(ks[3], (FEATURE_DIM, EMBED_DIM), jnp.float32),
        "output_proj_bias": jnp.zeros((FEATURE_DIM,), jnp.float32),
    }


def _reference_forward(line_features, line_positions, params):
    """Pure-JAX f32 reference mirroring torch.nn.MultiheadAttention + Linear (inference)."""
    pos_emb = jnp.take(params["pos_embedding"], line_positions, axis=0)
    x = jnp.concatenate([line_features, pos_emb], axis=-1)                     # (B, S, E)
    qkv = jnp.einsum("bse,fe->bsf", x, params["in_proj_weight"]) + params["in_proj_bias"]
    q, k, v = jnp.split(qkv, 3, axis=-1)
    B, S, _ = q.shape
    split = lambda t: t.reshape(B, S, NUM_HEADS, HEAD_DIM).transpose(0, 2, 1, 3)
    qh, kh, vh = split(q), split(k), split(v)
    s = jnp.einsum("bhqd,bhkd->bhqk", qh, kh) / math.sqrt(HEAD_DIM)
    p = jax.nn.softmax(s, axis=-1)
    a = jnp.einsum("bhqk,bhkd->bhqd", p, vh).transpose(0, 2, 1, 3).reshape(B, S, EMBED_DIM)
    o = jnp.einsum("bse,fe->bsf", a, params["out_proj_weight"]) + params["out_proj_bias"]
    return jnp.einsum("bse,fe->bsf", o, params["output_proj_weight"]) + params["output_proj_bias"]


if __name__ == "__main__":
    B, S = 2, 8
    key = jax.random.PRNGKey(0)
    k_feat, k_pos, k_param = jax.random.split(key, 3)

    line_features = jax.random.normal(k_feat, (B, S, FEATURE_DIM), jnp.float32)
    line_positions = jax.random.randint(k_pos, (B, S), 0, NUM_POSITIONS, jnp.int32)
    params = init_params(k_param)

    out = inter_line_relationship(line_features, line_positions, params)
    out = jax.block_until_ready(out)
    assert out.shape == (B, S, FEATURE_DIM), out.shape

    ref = jax.block_until_ready(_reference_forward(line_features, line_positions, params))
    # Tolerance accounts for bf16 MXU operands + approx EUP reciprocal (f32 accumulation/softmax).
    assert jnp.allclose(out, ref, atol=2e-3, rtol=2e-2), float(jnp.max(jnp.abs(out - ref)))

    print("KERNEL_OK")
</pallas_src>

<mosaic_0001>
module attributes {stable_mosaic.version = 11 : i64} {
  func.func @_inter_line_kernel(%arg0: i32, %arg1: memref<2x8x128xbf16, #tpu.memory_space<vmem>>, %arg2: memref<2x8x64xbf16, #tpu.memory_space<vmem>>, %arg3: memref<3x128x192xbf16, #tpu.memory_space<vmem>>, %arg4: memref<3x64x192xbf16, #tpu.memory_space<vmem>>, %arg5: memref<3x1x192xf32, #tpu.memory_space<vmem>>, %arg6: memref<8x24x192xbf16, #tpu.memory_space<vmem>>, %arg7: memref<1x192xf32, #tpu.memory_space<vmem>>, %arg8: memref<192x128xbf16, #tpu.memory_space<vmem>>, %arg9: memref<1x128xf32, #tpu.memory_space<vmem>>, %arg10: memref<2x8x128xf32, #tpu.memory_space<vmem>>) attributes {dimension_semantics = [#tpu.dimension_semantics<parallel>], iteration_bounds = array<i64: 1>, scalar_prefetch = 0 : i64, scratch_operands = 0 : i64, tpu.core_type = #tpu.core_type<tc>, window_params = [{transform_indices = @transform_0, window_bounds = array<i64: 2, 8, 128>}, {transform_indices = @transform_1, window_bounds = array<i64: 2, 8, 64>}, {pipeline_mode = #tpu.pipeline_mode<synchronous>, transform_indices = @transform_2, window_bounds = array<i64: 3, 128, 192>}, {pipeline_mode = #tpu.pipeline_mode<synchronous>, transform_indices = @transform_3, window_bounds = array<i64: 3, 64, 192>}, {pipeline_mode = #tpu.pipeline_mode<synchronous>, transform_indices = @transform_4, window_bounds = array<i64: 3, 1, 192>}, {pipeline_mode = #tpu.pipeline_mode<synchronous>, transform_indices = @transform_5, window_bounds = array<i64: 8, 24, 192>}, {pipeline_mode = #tpu.pipeline_mode<synchronous>, transform_indices = @transform_6, window_bounds = array<i64: 1, 192>}, {pipeline_mode = #tpu.pipeline_mode<synchronous>, transform_indices = @transform_7, window_bounds = array<i64: 192, 128>}, {pipeline_mode = #tpu.pipeline_mode<synchronous>, transform_indices = @transform_8, window_bounds = array<i64: 1, 128>}, {transform_indices = @transform_9, window_bounds = array<i64: 2, 8, 128>}]} {
    %c0 = arith.constant 0 : index
    %c0_0 = arith.constant 0 : index
    %c0_1 = arith.constant 0 : index
    %0 = vector.load %arg1[%c0, %c0_0, %c0_1] : memref<2x8x128xbf16, #tpu.memory_space<vmem>>, vector<2x8x128xbf16>
    %1 = vector.shape_cast %0 : vector<2x8x128xbf16> to vector<16x128xbf16>
    %c0_2 = arith.constant 0 : index
    %c0_3 = arith.constant 0 : index
    %c0_4 = arith.constant 0 : index
    %2 = vector.load %arg2[%c0_2, %c0_3, %c0_4] : memref<2x8x64xbf16, #tpu.memory_space<vmem>>, vector<2x8x64xbf16>
    %3 = vector.shape_cast %2 : vector<2x8x64xbf16> to vector<16x64xbf16>
    %c0_5 = arith.constant 0 : index
    %c0_6 = arith.constant 0 : index
    %c0_7 = arith.constant 0 : index
    %4 = vector.load %arg3[%c0_5, %c0_6, %c0_7] : memref<3x128x192xbf16, #tpu.memory_space<vmem>>, vector<1x128x192xbf16>
    %5 = vector.shape_cast %4 : vector<1x128x192xbf16> to vector<128x192xbf16>
    %cst = arith.constant dense<0.000000e+00> : vector<16x192xf32>
    %6 = tpu.matmul %1, %5, %cst {dimension_numbers = #tpu.dot_dimension_numbers<[1], [0], [0], [1], [0, 0, 1, 1], [], []>} : vector<16x128xbf16>, vector<128x192xbf16>, vector<16x192xf32> -> vector<16x192xf32>
    %c0_8 = arith.constant 0 : index
    %c0_9 = arith.constant 0 : index
    %c0_10 = arith.constant 0 : index
    %7 = vector.load %arg4[%c0_8, %c0_9, %c0_10] : memref<3x64x192xbf16, #tpu.memory_space<vmem>>, vector<1x64x192xbf16>
    %8 = vector.shape_cast %7 : vector<1x64x192xbf16> to vector<64x192xbf16>
    %cst_11 = arith.constant dense<0.000000e+00> : vector<16x192xf32>
    %9 = tpu.matmul %3, %8, %cst_11 {dimension_numbers = #tpu.dot_dimension_numbers<[1], [0], [0], [1], [0, 0, 1, 1], [], []>} : vector<16x64xbf16>, vector<64x192xbf16>, vector<16x192xf32> -> vector<16x192xf32>
    %10 = arith.addf %6, %9 : vector<16x192xf32>
    %c0_12 = arith.constant 0 : index
    %c0_13 = arith.constant 0 : index
    %c0_14 = arith.constant 0 : index
    %11 = vector.load %arg5[%c0_12, %c0_13, %c0_14] : memref<3x1x192xf32, #tpu.memory_space<vmem>>, vector<1x1x192xf32>
    %12 = vector.shape_cast %11 : vector<1x1x192xf32> to vector<1x192xf32>
    %13 = vector.broadcast %12 : vector<1x192xf32> to vector<16x192xf32>
    %14 = arith.addf %10, %13 : vector<16x192xf32>
    %c1 = arith.constant 1 : index
    %c0_15 = arith.constant 0 : index
    %c0_16 = arith.constant 0 : index
    %15 = vector.load %arg3[%c1, %c0_15, %c0_16] : memref<3x128x192xbf16, #tpu.memory_space<vmem>>, vector<1x128x192xbf16>
    %16 = vector.shape_cast %15 : vector<1x128x192xbf16> to vector<128x192xbf16>
    %cst_17 = arith.constant dense<0.000000e+00> : vector<16x192xf32>
    %17 = tpu.matmul %1, %16, %cst_17 {dimension_numbers = #tpu.dot_dimension_numbers<[1], [0], [0], [1], [0, 0, 1, 1], [], []>} : vector<16x128xbf16>, vector<128x192xbf16>, vector<16x192xf32> -> vector<16x192xf32>
    %c1_18 = arith.constant 1 : index
    %c0_19 = arith.constant 0 : index
    %c0_20 = arith.constant 0 : index
    %18 = vector.load %arg4[%c1_18, %c0_19, %c0_20] : memref<3x64x192xbf16, #tpu.memory_space<vmem>>, vector<1x64x192xbf16>
    %19 = vector.shape_cast %18 : vector<1x64x192xbf16> to vector<64x192xbf16>
    %cst_21 = arith.constant dense<0.000000e+00> : vector<16x192xf32>
    %20 = tpu.matmul %3, %19, %cst_21 {dimension_numbers = #tpu.dot_dimension_numbers<[1], [0], [0], [1], [0, 0, 1, 1], [], []>} : vector<16x64xbf16>, vector<64x192xbf16>, vector<16x192xf32> -> vector<16x192xf32>
    %21 = arith.addf %17, %20 : vector<16x192xf32>
    %c1_22 = arith.constant 1 : index
    %c0_23 = arith.constant 0 : index
    %c0_24 = arith.constant 0 : index
    %22 = vector.load %arg5[%c1_22, %c0_23, %c0_24] : memref<3x1x192xf32, #tpu.memory_space<vmem>>, vector<1x1x192xf32>
    %23 = vector.shape_cast %22 : vector<1x1x192xf32> to vector<1x192xf32>
    %24 = vector.broadcast %23 : vector<1x192xf32> to vector<16x192xf32>
    %25 = arith.addf %21, %24 : vector<16x192xf32>
    %c2 = arith.constant 2 : index
    %c0_25 = arith.constant 0 : index
    %c0_26 = arith.constant 0 : index
    %26 = vector.load %arg3[%c2, %c0_25, %c0_26] : memref<3x128x192xbf16, #tpu.memory_space<vmem>>, vector<1x128x192xbf16>
    %27 = vector.shape_cast %26 : vector<1x128x192xbf16> to vector<128x192xbf16>
    %cst_27 = arith.constant dense<0.000000e+00> : vector<16x192xf32>
    %28 = tpu.matmul %1, %27, %cst_27 {dimension_numbers = #tpu.dot_dimension_numbers<[1], [0], [0], [1], [0, 0, 1, 1], [], []>} : vector<16x128xbf16>, vector<128x192xbf16>, vector<16x192xf32> -> vector<16x192xf32>
    %c2_28 = arith.constant 2 : index
    %c0_29 = arith.constant 0 : index
    %c0_30 = arith.constant 0 : index
    %29 = vector.load %arg4[%c2_28, %c0_29, %c0_30] : memref<3x64x192xbf16, #tpu.memory_space<vmem>>, vector<1x64x192xbf16>
    %30 = vector.shape_cast %29 : vector<1x64x192xbf16> to vector<64x192xbf16>
    %cst_31 = arith.constant dense<0.000000e+00> : vector<16x192xf32>
    %31 = tpu.matmul %3, %30, %cst_31 {dimension_numbers = #tpu.dot_dimension_numbers<[1], [0], [0], [1], [0, 0, 1, 1], [], []>} : vector<16x64xbf16>, vector<64x192xbf16>, vector<16x192xf32> -> vector<16x192xf32>
    %32 = arith.addf %28, %31 : vector<16x192xf32>
    %c2_32 = arith.constant 2 : index
    %c0_33 = arith.constant 0 : index
    %c0_34 = arith.constant 0 : index
    %33 = vector.load %arg5[%c2_32, %c0_33, %c0_34] : memref<3x1x192xf32, #tpu.memory_space<vmem>>, vector<1x1x192xf32>
    %34 = vector.shape_cast %33 : vector<1x1x192xf32> to vector<1x192xf32>
    %35 = vector.broadcast %34 : vector<1x192xf32> to vector<16x192xf32>
    %36 = arith.addf %32, %35 : vector<16x192xf32>
    %37 = arith.truncf %14 : vector<16x192xf32> to vector<16x192xbf16>
    %38 = vector.shape_cast %37 : vector<16x192xbf16> to vector<2x8x192xbf16>
    %39 = arith.truncf %25 : vector<16x192xf32> to vector<16x192xbf16>
    %40 = vector.shape_cast %39 : vector<16x192xbf16> to vector<2x8x192xbf16>
    %41 = arith.truncf %36 : vector<16x192xf32> to vector<16x192xbf16>
    %42 = vector.shape_cast %41 : vector<16x192xbf16> to vector<2x8x192xbf16>
    %43 = vector.extract_strided_slice %38 {offsets = [0, 0, 0], sizes = [2, 8, 24], strides = [1, 1, 1]} : vector<2x8x192xbf16> to vector<2x8x24xbf16>
    %44 = vector.extract_strided_slice %40 {offsets = [0, 0, 0], sizes = [2, 8, 24], strides = [1, 1, 1]} : vector<2x8x192xbf16> to vector<2x8x24xbf16>
    %45 = vector.extract_strided_slice %42 {offsets = [0, 0, 0], sizes = [2, 8, 24], strides = [1, 1, 1]} : vector<2x8x192xbf16> to vector<2x8x24xbf16>
    "tpu.trace_start"() <{level = 10 : i32, message = "bqd,bkd->bqk"}> : () -> ()
    %cst_35 = arith.constant dense<0.000000e+00> : vector<2x8x8xf32>
    %46 = tpu.matmul %43, %44, %cst_35 {dimension_numbers = #tpu.dot_dimension_numbers<[2], [2], [1], [1], [0, 0, 0, 1, 1, 1], [0], [0]>} : vector<2x8x24xbf16>, vector<2x8x24xbf16>, vector<2x8x8xf32> -> vector<2x8x8xf32>
    "tpu.trace_stop"() : () -> ()
    %cst_36 = arith.constant dense<0xFF800000> : vector<2x8xf32>
    %47 = vector.multi_reduction <maximumf>, %46, %cst_36 [2] : vector<2x8x8xf32> to vector<2x8xf32>
    %48 = vector.shape_cast %47 : vector<2x8xf32> to vector<2x8x1xf32>
    %49 = vector.broadcast %48 : vector<2x8x1xf32> to vector<2x8x8xf32>
    %50 = arith.subf %46, %49 : vector<2x8x8xf32>
    %51 = math.exp %50 : vector<2x8x8xf32>
    %cst_37 = arith.constant dense<0.000000e+00> : vector<2x8xf32>
    %52 = vector.multi_reduction <add>, %51, %cst_37 [2] : vector<2x8x8xf32> to vector<2x8xf32>
    %53 = vector.shape_cast %52 : vector<2x8xf32> to vector<2x8x1xf32>
    %54 = tpu.reciprocal %53 {approx = true} : vector<2x8x1xf32> -> vector<2x8x1xf32>
    %55 = vector.broadcast %54 : vector<2x8x1xf32> to vector<2x8x8xf32>
    %56 = arith.mulf %51, %55 : vector<2x8x8xf32>
    %57 = arith.truncf %56 : vector<2x8x8xf32> to vector<2x8x8xbf16>
    "tpu.trace_start"() <{level = 10 : i32, message = "bqk,bkd->bqd"}> : () -> ()
    %cst_38 = arith.constant dense<0.000000e+00> : vector<2x8x24xf32>
    %58 = tpu.matmul %57, %45, %cst_38 {dimension_numbers = #tpu.dot_dimension_numbers<[2], [1], [1], [2], [0, 0, 0, 1, 1, 2], [0], [0]>} : vector<2x8x8xbf16>, vector<2x8x24xbf16>, vector<2x8x24xf32> -> vector<2x8x24xf32>
    "tpu.trace_stop"() : () -> ()
    %59 = vector.shape_cast %58 : vector<2x8x24xf32> to vector<16x24xf32>
    %60 = arith.truncf %59 : vector<16x24xf32> to vector<16x24xbf16>
    %c0_39 = arith.constant 0 : index
    %c0_40 = arith.constant 0 : index
    %c0_41 = arith.constant 0 : index
    %61 = vector.load %arg6[%c0_39, %c0_40, %c0_41] : memref<8x24x192xbf16, #tpu.memory_space<vmem>>, vector<1x24x192xbf16>
    %62 = vector.shape_cast %61 : vector<1x24x192xbf16> to vector<24x192xbf16>
    %cst_42 = arith.constant dense<0.000000e+00> : vector<16x192xf32>
    %63 = tpu.matmul %60, %62, %cst_42 {dimension_numbers = #tpu.dot_dimension_numbers<[1], [0], [0], [1], [0, 0, 1, 1], [], []>} : vector<16x24xbf16>, vector<24x192xbf16>, vector<16x192xf32> -> vector<16x192xf32>
    %64 = vector.extract_strided_slice %38 {offsets = [0, 0, 24], sizes = [2, 8, 24], strides = [1, 1, 1]} : vector<2x8x192xbf16> to vector<2x8x24xbf16>
    %65 = vector.extract_strided_slice %40 {offsets = [0, 0, 24], sizes = [2, 8, 24], strides = [1, 1, 1]} : vector<2x8x192xbf16> to vector<2x8x24xbf16>
    %66 = vector.extract_strided_slice %42 {offsets = [0, 0, 24], sizes = [2, 8, 24], strides = [1, 1, 1]} : vector<2x8x192xbf16> to vector<2x8x24xbf16>
    "tpu.trace_start"() <{level = 10 : i32, message = "bqd,bkd->bqk"}> : () -> ()
    %cst_43 = arith.constant dense<0.000000e+00> : vector<2x8x8xf32>
    %67 = tpu.matmul %64, %65, %cst_43 {dimension_numbers = #tpu.dot_dimension_numbers<[2], [2], [1], [1], [0, 0, 0, 1, 1, 1], [0], [0]>} : vector<2x8x24xbf16>, vector<2x8x24xbf16>, vector<2x8x8xf32> -> vector<2x8x8xf32>
    "tpu.trace_stop"() : () -> ()
    %cst_44 = arith.constant dense<0xFF800000> : vector<2x8xf32>
    %68 = vector.multi_reduction <maximumf>, %67, %cst_44 [2] : vector<2x8x8xf32> to vector<2x8xf32>
    %69 = vector.shape_cast %68 : vector<2x8xf32> to vector<2x8x1xf32>
    %70 = vector.broadcast %69 : vector<2x8x1xf32> to vector<2x8x8xf32>
    %71 = arith.subf %67, %70 : vector<2x8x8xf32>
    %72 = math.exp %71 : vector<2x8x8xf32>
    %cst_45 = arith.constant dense<0.000000e+00> : vector<2x8xf32>
    %73 = vector.multi_reduction <add>, %72, %cst_45 [2] : vector<2x8x8xf32> to vector<2x8xf32>
    %74 = vector.shape_cast %73 : vector<2x8xf32> to vector<2x8x1xf32>
    %75 = tpu.reciprocal %74 {approx = true} : vector<2x8x1xf32> -> vector<2x8x1xf32>
    %76 = vector.broadcast %75 : vector<2x8x1xf32> to vector<2x8x8xf32>
    %77 = arith.mulf %72, %76 : vector<2x8x8xf32>
    %78 = arith.truncf %77 : vector<2x8x8xf32> to vector<2x8x8xbf16>
    "tpu.trace_start"() <{level = 10 : i32, message = "bqk,bkd->bqd"}> : () -> ()
    %cst_46 = arith.constant dense<0.000000e+00> : vector<2x8x24xf32>
    %79 = tpu.matmul %78, %66, %cst_46 {dimension_numbers = #tpu.dot_dimension_numbers<[2], [1], [1], [2], [0, 0, 0, 1, 1, 2], [0], [0]>} : vector<2x8x8xbf16>, vector<2x8x24xbf16>, vector<2x8x24xf32> -> vector<2x8x24xf32>
    "tpu.trace_stop"() : () -> ()
    %80 = vector.shape_cast %79 : vector<2x8x24xf32> to vector<16x24xf32>
    %81 = arith.truncf %80 : vector<16x24xf32> to vector<16x24xbf16>
    %c1_47 = arith.constant 1 : index
    %c0_48 = arith.constant 0 : index
    %c0_49 = arith.constant 0 : index
    %82 = vector.load %arg6[%c1_47, %c0_48, %c0_49] : memref<8x24x192xbf16, #tpu.memory_space<vmem>>, vector<1x24x192xbf16>
    %83 = vector.shape_cast %82 : vector<1x24x192xbf16> to vector<24x192xbf16>
    %cst_50 = arith.constant dense<0.000000e+00> : vector<16x192xf32>
    %84 = tpu.matmul %81, %83, %cst_50 {dimension_numbers = #tpu.dot_dimension_numbers<[1], [0], [0], [1], [0, 0, 1, 1], [], []>} : vector<16x24xbf16>, vector<24x192xbf16>, vector<16x192xf32> -> vector<16x192xf32>
    %85 = arith.addf %63, %84 : vector<16x192xf32>
    %86 = vector.extract_strided_slice %38 {offsets = [0, 0, 48], sizes = [2, 8, 24], strides = [1, 1, 1]} : vector<2x8x192xbf16> to vector<2x8x24xbf16>
    %87 = vector.extract_strided_slice %40 {offsets = [0, 0, 48], sizes = [2, 8, 24], strides = [1, 1, 1]} : vector<2x8x192xbf16> to vector<2x8x24xbf16>
    %88 = vector.extract_strided_slice %42 {offsets = [0, 0, 48], sizes = [2, 8, 24], strides = [1, 1, 1]} : vector<2x8x192xbf16> to vector<2x8x24xbf16>
    "tpu.trace_start"() <{level = 10 : i32, message = "bqd,bkd->bqk"}> : () -> ()
    %cst_51 = arith.constant dense<0.000000e+00> : vector<2x8x8xf32>
    %89 = tpu.matmul %86, %87, %cst_51 {dimension_numbers = #tpu.dot_dimension_numbers<[2], [2], [1], [1], [0, 0, 0, 1, 1, 1], [0], [0]>} : vector<2x8x24xbf16>, vector<2x8x24xbf16>, vector<2x8x8xf32> -> vector<2x8x8xf32>
    "tpu.trace_stop"() : () -> ()
    %cst_52 = arith.constant dense<0xFF800000> : vector<2x8xf32>
    %90 = vector.multi_reduction <maximumf>, %89, %cst_52 [2] : vector<2x8x8xf32> to vector<2x8xf32>
    %91 = vector.shape_cast %90 : vector<2x8xf32> to vector<2x8x1xf32>
    %92 = vector.broadcast %91 : vector<2x8x1xf32> to vector<2x8x8xf32>
    %93 = arith.subf %89, %92 : vector<2x8x8xf32>
    %94 = math.exp %93 : vector<2x8x8xf32>
    %cst_53 = arith.constant dense<0.000000e+00> : vector<2x8xf32>
    %95 = vector.multi_reduction <add>, %94, %cst_53 [2] : vector<2x8x8xf32> to vector<2x8xf32>
    %96 = vector.shape_cast %95 : vector<2x8xf32> to vector<2x8x1xf32>
    %97 = tpu.reciprocal %96 {approx = true} : vector<2x8x1xf32> -> vector<2x8x1xf32>
    %98 = vector.broadcast %97 : vector<2x8x1xf32> to vector<2x8x8xf32>
    %99 = arith.mulf %94, %98 : vector<2x8x8xf32>
    %100 = arith.truncf %99 : vector<2x8x8xf32> to vector<2x8x8xbf16>
    "tpu.trace_start"() <{level = 10 : i32, message = "bqk,bkd->bqd"}> : () -> ()
    %cst_54 = arith.constant dense<0.000000e+00> : vector<2x8x24xf32>
    %101 = tpu.matmul %100, %88, %cst_54 {dimension_numbers = #tpu.dot_dimension_numbers<[2], [1], [1], [2], [0, 0, 0, 1, 1, 2], [0], [0]>} : vector<2x8x8xbf16>, vector<2x8x24xbf16>, vector<2x8x24xf32> -> vector<2x8x24xf32>
    "tpu.trace_stop"() : () -> ()
    %102 = vector.shape_cast %101 : vector<2x8x24xf32> to vector<16x24xf32>
    %103 = arith.truncf %102 : vector<16x24xf32> to vector<16x24xbf16>
    %c2_55 = arith.constant 2 : index
    %c0_56 = arith.constant 0 : index
    %c0_57 = arith.constant 0 : index
    %104 = vector.load %arg6[%c2_55, %c0_56, %c0_57] : memref<8x24x192xbf16, #tpu.memory_space<vmem>>, vector<1x24x192xbf16>
    %105 = vector.shape_cast %104 : vector<1x24x192xbf16> to vector<24x192xbf16>
    %cst_58 = arith.constant dense<0.000000e+00> : vector<16x192xf32>
    %106 = tpu.matmul %103, %105, %cst_58 {dimension_numbers = #tpu.dot_dimension_numbers<[1], [0], [0], [1], [0, 0, 1, 1], [], []>} : vector<16x24xbf16>, vector<24x192xbf16>, vector<16x192xf32> -> vector<16x192xf32>
    %107 = arith.addf %85, %106 : vector<16x192xf32>
    %108 = vector.extract_strided_slice %38 {offsets = [0, 0, 72], sizes = [2, 8, 24], strides = [1, 1, 1]} : vector<2x8x192xbf16> to vector<2x8x24xbf16>
    %109 = vector.extract_strided_slice %40 {offsets = [0, 0, 72], sizes = [2, 8, 24], strides = [1, 1, 1]} : vector<2x8x192xbf16> to vector<2x8x24xbf16>
    %110 = vector.extract_strided_slice %42 {offsets = [0, 0, 72], sizes = [2, 8, 24], strides = [1, 1, 1]} : vector<2x8x192xbf16> to vector<2x8x24xbf16>
    "tpu.trace_start"() <{level = 10 : i32, message = "bqd,bkd->bqk"}> : () -> ()
    %cst_59 = arith.constant dense<0.000000e+00> : vector<2x8x8xf32>
    %111 = tpu.matmul %108, %109, %cst_59 {dimension_numbers = #tpu.dot_dimension_numbers<[2], [2], [1], [1], [0, 0, 0, 1, 1, 1], [0], [0]>} : vector<2x8x24xbf16>, vector<2x8x24xbf16>, vector<2x8x8xf32> -> vector<2x8x8xf32>
    "tpu.trace_stop"() : () -> ()
    %cst_60 = arith.constant dense<0xFF800000> : vector<2x8xf32>
    %112 = vector.multi_reduction <maximumf>, %111, %cst_60 [2] : vector<2x8x8xf32> to vector<2x8xf32>
    %113 = vector.shape_cast %112 : vector<2x8xf32> to vector<2x8x1xf32>
    %114 = vector.broadcast %113 : vector<2x8x1xf32> to vector<2x8x8xf32>
    %115 = arith.subf %111, %114 : vector<2x8x8xf32>
    %116 = math.exp %115 : vector<2x8x8xf32>
    %cst_61 = arith.constant dense<0.000000e+00> : vector<2x8xf32>
    %117 = vector.multi_reduction <add>, %116, %cst_61 [2] : vector<2x8x8xf32> to vector<2x8xf32>
    %118 = vector.shape_cast %117 : vector<2x8xf32> to vector<2x8x1xf32>
    %119 = tpu.reciprocal %118 {approx = true} : vector<2x8x1xf32> -> vector<2x8x1xf32>
    %120 = vector.broadcast %119 : vector<2x8x1xf32> to vector<2x8x8xf32>
    %121 = arith.mulf %116, %120 : vector<2x8x8xf32>
    %122 = arith.truncf %121 : vector<2x8x8xf32> to vector<2x8x8xbf16>
    "tpu.trace_start"() <{level = 10 : i32, message = "bqk,bkd->bqd"}> : () -> ()
    %cst_62 = arith.constant dense<0.000000e+00> : vector<2x8x24xf32>
    %123 = tpu.matmul %122, %110, %cst_62 {dimension_numbers = #tpu.dot_dimension_numbers<[2], [1], [1], [2], [0, 0, 0, 1, 1, 2], [0], [0]>} : vector<2x8x8xbf16>, vector<2x8x24xbf16>, vector<2x8x24xf32> -> vector<2x8x24xf32>
    "tpu.trace_stop"() : () -> ()
    %124 = vector.shape_cast %123 : vector<2x8x24xf32> to vector<16x24xf32>
    %125 = arith.truncf %124 : vector<16x24xf32> to vector<16x24xbf16>
    %c3 = arith.constant 3 : index
    %c0_63 = arith.constant 0 : index
    %c0_64 = arith.constant 0 : index
    %126 = vector.load %arg6[%c3, %c0_63, %c0_64] : memref<8x24x192xbf16, #tpu.memory_space<vmem>>, vector<1x24x192xbf16>
    %127 = vector.shape_cast %126 : vector<1x24x192xbf16> to vector<24x192xbf16>
    %cst_65 = arith.constant dense<0.000000e+00> : vector<16x192xf32>
    %128 = tpu.matmul %125, %127, %cst_65 {dimension_numbers = #tpu.dot_dimension_numbers<[1], [0], [0], [1], [0, 0, 1, 1], [], []>} : vector<16x24xbf16>, vector<24x192xbf16>, vector<16x192xf32> -> vector<16x192xf32>
    %129 = arith.addf %107, %128 : vector<16x192xf32>
    %130 = vector.extract_strided_slice %38 {offsets = [0, 0, 96], sizes = [2, 8, 24], strides = [1, 1, 1]} : vector<2x8x192xbf16> to vector<2x8x24xbf16>
    %131 = vector.extract_strided_slice %40 {offsets = [0, 0, 96], sizes = [2, 8, 24], strides = [1, 1, 1]} : vector<2x8x192xbf16> to vector<2x8x24xbf16>
    %132 = vector.extract_strided_slice %42 {offsets = [0, 0, 96], sizes = [2, 8, 24], strides = [1, 1, 1]} : vector<2x8x192xbf16> to vector<2x8x24xbf16>
    "tpu.trace_start"() <{level = 10 : i32, message = "bqd,bkd->bqk"}> : () -> ()
    %cst_66 = arith.constant dense<0.000000e+00> : vector<2x8x8xf32>
    %133 = tpu.matmul %130, %131, %cst_66 {dimension_numbers = #tpu.dot_dimension_numbers<[2], [2], [1], [1], [0, 0, 0, 1, 1, 1], [0], [0]>} : vector<2x8x24xbf16>, vector<2x8x24xbf16>, vector<2x8x8xf32> -> vector<2x8x8xf32>
    "tpu.trace_stop"() : () -> ()
    %cst_67 = arith.constant dense<0xFF800000> : vector<2x8xf32>
    %134 = vector.multi_reduction <maximumf>, %133, %cst_67 [2] : vector<2x8x8xf32> to vector<2x8xf32>
    %135 = vector.shape_cast %134 : vector<2x8xf32> to vector<2x8x1xf32>
    %136 = vector.broadcast %135 : vector<2x8x1xf32> to vector<2x8x8xf32>
    %137 = arith.subf %133, %136 : vector<2x8x8xf32>
    %138 = math.exp %137 : vector<2x8x8xf32>
    %cst_68 = arith.constant dense<0.000000e+00> : vector<2x8xf32>
    %139 = vector.multi_reduction <add>, %138, %cst_68 [2] : vector<2x8x8xf32> to vector<2x8xf32>
    %140 = vector.shape_cast %139 : vector<2x8xf32> to vector<2x8x1xf32>
    %141 = tpu.reciprocal %140 {approx = true} : vector<2x8x1xf32> -> vector<2x8x1xf32>
    %142 = vector.broadcast %141 : vector<2x8x1xf32> to vector<2x8x8xf32>
    %143 = arith.mulf %138, %142 : vector<2x8x8xf32>
    %144 = arith.truncf %143 : vector<2x8x8xf32> to vector<2x8x8xbf16>
    "tpu.trace_start"() <{level = 10 : i32, message = "bqk,bkd->bqd"}> : () -> ()
    %cst_69 = arith.constant dense<0.000000e+00> : vector<2x8x24xf32>
    %145 = tpu.matmul %144, %132, %cst_69 {dimension_numbers = #tpu.dot_dimension_numbers<[2], [1], [1], [2], [0, 0, 0, 1, 1, 2], [0], [0]>} : vector<2x8x8xbf16>, vector<2x8x24xbf16>, vector<2x8x24xf32> -> vector<2x8x24xf32>
    "tpu.trace_stop"() : () -> ()
    %146 = vector.shape_cast %145 : vector<2x8x24xf32> to vector<16x24xf32>
    %147 = arith.truncf %146 : vector<16x24xf32> to vector<16x24xbf16>
    %c4 = arith.constant 4 : index
    %c0_70 = arith.constant 0 : index
    %c0_71 = arith.constant 0 : index
    %148 = vector.load %arg6[%c4, %c0_70, %c0_71] : memref<8x24x192xbf16, #tpu.memory_space<vmem>>, vector<1x24x192xbf16>
    %149 = vector.shape_cast %148 : vector<1x24x192xbf16> to vector<24x192xbf16>
    %cst_72 = arith.constant dense<0.000000e+00> : vector<16x192xf32>
    %150 = tpu.matmul %147, %149, %cst_72 {dimension_numbers = #tpu.dot_dimension_numbers<[1], [0], [0], [1], [0, 0, 1, 1], [], []>} : vector<16x24xbf16>, vector<24x192xbf16>, vector<16x192xf32> -> vector<16x192xf32>
    %151 = arith.addf %129, %150 : vector<16x192xf32>
    %152 = vector.extract_strided_slice %38 {offsets = [0, 0, 120], sizes = [2, 8, 24], strides = [1, 1, 1]} : vector<2x8x192xbf16> to vector<2x8x24xbf16>
    %153 = vector.extract_strided_slice %40 {offsets = [0, 0, 120], sizes = [2, 8, 24], strides = [1, 1, 1]} : vector<2x8x192xbf16> to vector<2x8x24xbf16>
    %154 = vector.extract_strided_slice %42 {offsets = [0, 0, 120], sizes = [2, 8, 24], strides = [1, 1, 1]} : vector<2x8x192xbf16> to vector<2x8x24xbf16>
    "tpu.trace_start"() <{level = 10 : i32, message = "bqd,bkd->bqk"}> : () -> ()
    %cst_73 = arith.constant dense<0.000000e+00> : vector<2x8x8xf32>
    %155 = tpu.matmul %152, %153, %cst_73 {dimension_numbers = #tpu.dot_dimension_numbers<[2], [2], [1], [1], [0, 0, 0, 1, 1, 1], [0], [0]>} : vector<2x8x24xbf16>, vector<2x8x24xbf16>, vector<2x8x8xf32> -> vector<2x8x8xf32>
    "tpu.trace_stop"() : () -> ()
    %cst_74 = arith.constant dense<0xFF800000> : vector<2x8xf32>
    %156 = vector.multi_reduction <maximumf>, %155, %cst_74 [2] : vector<2x8x8xf32> to vector<2x8xf32>
    %157 = vector.shape_cast %156 : vector<2x8xf32> to vector<2x8x1xf32>
    %158 = vector.broadcast %157 : vector<2x8x1xf32> to vector<2x8x8xf32>
    %159 = arith.subf %155, %158 : vector<2x8x8xf32>
    %160 = math.exp %159 : vector<2x8x8xf32>
    %cst_75 = arith.constant dense<0.000000e+00> : vector<2x8xf32>
    %161 = vector.multi_reduction <add>, %160, %cst_75 [2] : vector<2x8x8xf32> to vector<2x8xf32>
    %162 = vector.shape_cast %161 : vector<2x8xf32> to vector<2x8x1xf32>
    %163 = tpu.reciprocal %162 {approx = true} : vector<2x8x1xf32> -> vector<2x8x1xf32>
    %164 = vector.broadcast %163 : vector<2x8x1xf32> to vector<2x8x8xf32>
    %165 = arith.mulf %160, %164 : vector<2x8x8xf32>
    %166 = arith.truncf %165 : vector<2x8x8xf32> to vector<2x8x8xbf16>
    "tpu.trace_start"() <{level = 10 : i32, message = "bqk,bkd->bqd"}> : () -> ()
    %cst_76 = arith.constant dense<0.000000e+00> : vector<2x8x24xf32>
    %167 = tpu.matmul %166, %154, %cst_76 {dimension_numbers = #tpu.dot_dimension_numbers<[2], [1], [1], [2], [0, 0, 0, 1, 1, 2], [0], [0]>} : vector<2x8x8xbf16>, vector<2x8x24xbf16>, vector<2x8x24xf32> -> vector<2x8x24xf32>
    "tpu.trace_stop"() : () -> ()
    %168 = vector.shape_cast %167 : vector<2x8x24xf32> to vector<16x24xf32>
    %169 = arith.truncf %168 : vector<16x24xf32> to vector<16x24xbf16>
    %c5 = arith.constant 5 : index
    %c0_77 = arith.constant 0 : index
    %c0_78 = arith.constant 0 : index
    %170 = vector.load %arg6[%c5, %c0_77, %c0_78] : memref<8x24x192xbf16, #tpu.memory_space<vmem>>, vector<1x24x192xbf16>
    %171 = vector.shape_cast %170 : vector<1x24x192xbf16> to vector<24x192xbf16>
    %cst_79 = arith.constant dense<0.000000e+00> : vector<16x192xf32>
    %172 = tpu.matmul %169, %171, %cst_79 {dimension_numbers = #tpu.dot_dimension_numbers<[1], [0], [0], [1], [0, 0, 1, 1], [], []>} : vector<16x24xbf16>, vector<24x192xbf16>, vector<16x192xf32> -> vector<16x192xf32>
    %173 = arith.addf %151, %172 : vector<16x192xf32>
    %174 = vector.extract_strided_slice %38 {offsets = [0, 0, 144], sizes = [2, 8, 24], strides = [1, 1, 1]} : vector<2x8x192xbf16> to vector<2x8x24xbf16>
    %175 = vector.extract_strided_slice %40 {offsets = [0, 0, 144], sizes = [2, 8, 24], strides = [1, 1, 1]} : vector<2x8x192xbf16> to vector<2x8x24xbf16>
    %176 = vector.extract_strided_slice %42 {offsets = [0, 0, 144], sizes = [2, 8, 24], strides = [1, 1, 1]} : vector<2x8x192xbf16> to vector<2x8x24xbf16>
    "tpu.trace_start"() <{level = 10 : i32, message = "bqd,bkd->bqk"}> : () -> ()
    %cst_80 = arith.constant dense<0.000000e+00> : vector<2x8x8xf32>
    %177 = tpu.matmul %174, %175, %cst_80 {dimension_numbers = #tpu.dot_dimension_numbers<[2], [2], [1], [1], [0, 0, 0, 1, 1, 1], [0], [0]>} : vector<2x8x24xbf16>, vector<2x8x24xbf16>, vector<2x8x8xf32> -> vector<2x8x8xf32>
    "tpu.trace_stop"() : () -> ()
    %cst_81 = arith.constant dense<0xFF800000> : vector<2x8xf32>
    %178 = vector.multi_reduction <maximumf>, %177, %cst_81 [2] : vector<2x8x8xf32> to vector<2x8xf32>
    %179 = vector.shape_cast %178 : vector<2x8xf32> to vector<2x8x1xf32>
    %180 = vector.broadcast %179 : vector<2x8x1xf32> to vector<2x8x8xf32>
    %181 = arith.subf %177, %180 : vector<2x8x8xf32>
    %182 = math.exp %181 : vector<2x8x8xf32>
    %cst_82 = arith.constant dense<0.000000e+00> : vector<2x8xf32>
    %183 = vector.multi_reduction <add>, %182, %cst_82 [2] : vector<2x8x8xf32> to vector<2x8xf32>
    %184 = vector.shape_cast %183 : vector<2x8xf32> to vector<2x8x1xf32>
    %185 = tpu.reciprocal %184 {approx = true} : vector<2x8x1xf32> -> vector<2x8x1xf32>
    %186 = vector.broadcast %185 : vector<2x8x1xf32> to vector<2x8x8xf32>
    %187 = arith.mulf %182, %186 : vector<2x8x8xf32>
    %188 = arith.truncf %187 : vector<2x8x8xf32> to vector<2x8x8xbf16>
    "tpu.trace_start"() <{level = 10 : i32, message = "bqk,bkd->bqd"}> : () -> ()
    %cst_83 = arith.constant dense<0.000000e+00> : vector<2x8x24xf32>
    %189 = tpu.matmul %188, %176, %cst_83 {dimension_numbers = #tpu.dot_dimension_numbers<[2], [1], [1], [2], [0, 0, 0, 1, 1, 2], [0], [0]>} : vector<2x8x8xbf16>, vector<2x8x24xbf16>, vector<2x8x24xf32> -> vector<2x8x24xf32>
    "tpu.trace_stop"() : () -> ()
    %190 = vector.shape_cast %189 : vector<2x8x24xf32> to vector<16x24xf32>
    %191 = arith.truncf %190 : vector<16x24xf32> to vector<16x24xbf16>
    %c6 = arith.constant 6 : index
    %c0_84 = arith.constant 0 : index
    %c0_85 = arith.constant 0 : index
    %192 = vector.load %arg6[%c6, %c0_84, %c0_85] : memref<8x24x192xbf16, #tpu.memory_space<vmem>>, vector<1x24x192xbf16>
    %193 = vector.shape_cast %192 : vector<1x24x192xbf16> to vector<24x192xbf16>
    %cst_86 = arith.constant dense<0.000000e+00> : vector<16x192xf32>
    %194 = tpu.matmul %191, %193, %cst_86 {dimension_numbers = #tpu.dot_dimension_numbers<[1], [0], [0], [1], [0, 0, 1, 1], [], []>} : vector<16x24xbf16>, vector<24x192xbf16>, vector<16x192xf32> -> vector<16x192xf32>
    %195 = arith.addf %173, %194 : vector<16x192xf32>
    %196 = vector.extract_strided_slice %38 {offsets = [0, 0, 168], sizes = [2, 8, 24], strides = [1, 1, 1]} : vector<2x8x192xbf16> to vector<2x8x24xbf16>
    %197 = vector.extract_strided_slice %40 {offsets = [0, 0, 168], sizes = [2, 8, 24], strides = [1, 1, 1]} : vector<2x8x192xbf16> to vector<2x8x24xbf16>
    %198 = vector.extract_strided_slice %42 {offsets = [0, 0, 168], sizes = [2, 8, 24], strides = [1, 1, 1]} : vector<2x8x192xbf16> to vector<2x8x24xbf16>
    "tpu.trace_start"() <{level = 10 : i32, message = "bqd,bkd->bqk"}> : () -> ()
    %cst_87 = arith.constant dense<0.000000e+00> : vector<2x8x8xf32>
    %199 = tpu.matmul %196, %197, %cst_87 {dimension_numbers = #tpu.dot_dimension_numbers<[2], [2], [1], [1], [0, 0, 0, 1, 1, 1], [0], [0]>} : vector<2x8x24xbf16>, vector<2x8x24xbf16>, vector<2x8x8xf32> -> vector<2x8x8xf32>
    "tpu.trace_stop"() : () -> ()
    %cst_88 = arith.constant dense<0xFF800000> : vector<2x8xf32>
    %200 = vector.multi_reduction <maximumf>, %199, %cst_88 [2] : vector<2x8x8xf32> to vector<2x8xf32>
    %201 = vector.shape_cast %200 : vector<2x8xf32> to vector<2x8x1xf32>
    %202 = vector.broadcast %201 : vector<2x8x1xf32> to vector<2x8x8xf32>
    %203 = arith.subf %199, %202 : vector<2x8x8xf32>
    %204 = math.exp %203 : vector<2x8x8xf32>
    %cst_89 = arith.constant dense<0.000000e+00> : vector<2x8xf32>
    %205 = vector.multi_reduction <add>, %204, %cst_89 [2] : vector<2x8x8xf32> to vector<2x8xf32>
    %206 = vector.shape_cast %205 : vector<2x8xf32> to vector<2x8x1xf32>
    %207 = tpu.reciprocal %206 {approx = true} : vector<2x8x1xf32> -> vector<2x8x1xf32>
    %208 = vector.broadcast %207 : vector<2x8x1xf32> to vector<2x8x8xf32>
    %209 = arith.mulf %204, %208 : vector<2x8x8xf32>
    %210 = arith.truncf %209 : vector<2x8x8xf32> to vector<2x8x8xbf16>
    "tpu.trace_start"() <{level = 10 : i32, message = "bqk,bkd->bqd"}> : () -> ()
    %cst_90 = arith.constant dense<0.000000e+00> : vector<2x8x24xf32>
    %211 = tpu.matmul %210, %198, %cst_90 {dimension_numbers = #tpu.dot_dimension_numbers<[2], [1], [1], [2], [0, 0, 0, 1, 1, 2], [0], [0]>} : vector<2x8x8xbf16>, vector<2x8x24xbf16>, vector<2x8x24xf32> -> vector<2x8x24xf32>
    "tpu.trace_stop"() : () -> ()
    %212 = vector.shape_cast %211 : vector<2x8x24xf32> to vector<16x24xf32>
    %213 = arith.truncf %212 : vector<16x24xf32> to vector<16x24xbf16>
    %c7 = arith.constant 7 : index
    %c0_91 = arith.constant 0 : index
    %c0_92 = arith.constant 0 : index
    %214 = vector.load %arg6[%c7, %c0_91, %c0_92] : memref<8x24x192xbf16, #tpu.memory_space<vmem>>, vector<1x24x192xbf16>
    %215 = vector.shape_cast %214 : vector<1x24x192xbf16> to vector<24x192xbf16>
    %cst_93 = arith.constant dense<0.000000e+00> : vector<16x192xf32>
    %216 = tpu.matmul %213, %215, %cst_93 {dimension_numbers = #tpu.dot_dimension_numbers<[1], [0], [0], [1], [0, 0, 1, 1], [], []>} : vector<16x24xbf16>, vector<24x192xbf16>, vector<16x192xf32> -> vector<16x192xf32>
    %217 = arith.addf %195, %216 : vector<16x192xf32>
    %c0_94 = arith.constant 0 : index
    %c0_95 = arith.constant 0 : index
    %218 = vector.load %arg7[%c0_94, %c0_95] : memref<1x192xf32, #tpu.memory_space<vmem>>, vector<1x192xf32>
    %219 = vector.broadcast %218 : vector<1x192xf32> to vector<16x192xf32>
    %220 = arith.addf %217, %219 : vector<16x192xf32>
    %221 = arith.truncf %220 : vector<16x192xf32> to vector<16x192xbf16>
    %c0_96 = arith.constant 0 : index
    %c0_97 = arith.constant 0 : index
    %222 = vector.load %arg8[%c0_96, %c0_97] : memref<192x128xbf16, #tpu.memory_space<vmem>>, vector<192x128xbf16>
    %cst_98 = arith.constant dense<0.000000e+00> : vector<16x128xf32>
    %223 = tpu.matmul %221, %222, %cst_98 {dimension_numbers = #tpu.dot_dimension_numbers<[1], [0], [0], [1], [0, 0, 1, 1], [], []>} : vector<16x192xbf16>, vector<192x128xbf16>, vector<16x128xf32> -> vector<16x128xf32>
    %c0_99 = arith.constant 0 : index
    %c0_100 = arith.constant 0 : index
    %224 = vector.load %arg9[%c0_99, %c0_100] : memref<1x128xf32, #tpu.memory_space<vmem>>, vector<1x128xf32>
    %225 = vector.broadcast %224 : vector<1x128xf32> to vector<16x128xf32>
    %226 = arith.addf %223, %225 : vector<16x128xf32>
    %227 = vector.shape_cast %226 : vector<16x128xf32> to vector<2x8x128xf32>
    %c0_101 = arith.constant 0 : index
    %c0_102 = arith.constant 0 : index
    %c0_103 = arith.constant 0 : index
    %228 = vector.load %arg10[%c0_101, %c0_102, %c0_103] : memref<2x8x128xf32, #tpu.memory_space<vmem>>, vector<2x8x128xf32>
    tpu.vector_store %arg10[%c0_101, %c0_102, %c0_103], %227 {strides = array<i32>} : memref<2x8x128xf32, #tpu.memory_space<vmem>>, vector<2x8x128xf32>,
    return
  }
  func.func @transform_0(%arg0: i32) -> (i32, i32, i32) {
    %c0_i32 = arith.constant 0 : i32
    %c0_i32_0 = arith.constant 0 : i32
    %c0_i32_1 = arith.constant 0 : i32
    return %arg0, %c0_i32, %c0_i32_0 : i32, i32, i32
  }
  func.func @transform_1(%arg0: i32) -> (i32, i32, i32) {
    %c0_i32 = arith.constant 0 : i32
    %c0_i32_0 = arith.constant 0 : i32
    %c0_i32_1 = arith.constant 0 : i32
    return %arg0, %c0_i32, %c0_i32_0 : i32, i32, i32
  }
  func.func @transform_2(%arg0: i32) -> (i32, i32, i32) {
    %c0_i32 = arith.constant 0 : i32
    %c0_i32_0 = arith.constant 0 : i32
    %c0_i32_1 = arith.constant 0 : i32
    %c0_i32_2 = arith.constant 0 : i32
    return %c0_i32, %c0_i32_0, %c0_i32_1 : i32, i32, i32
  }
  func.func @transform_3(%arg0: i32) -> (i32, i32, i32) {
    %c0_i32 = arith.constant 0 : i32
    %c0_i32_0 = arith.constant 0 : i32
    %c0_i32_1 = arith.constant 0 : i32
    %c0_i32_2 = arith.constant 0 : i32
    return %c0_i32, %c0_i32_0, %c0_i32_1 : i32, i32, i32
  }
  func.func @transform_4(%arg0: i32) -> (i32, i32, i32) {
    %c0_i32 = arith.constant 0 : i32
    %c0_i32_0 = arith.constant 0 : i32
    %c0_i32_1 = arith.constant 0 : i32
    %c0_i32_2 = arith.constant 0 : i32
    return %c0_i32, %c0_i32_0, %c0_i32_1 : i32, i32, i32
  }
  func.func @transform_5(%arg0: i32) -> (i32, i32, i32) {
    %c0_i32 = arith.constant 0 : i32
    %c0_i32_0 = arith.constant 0 : i32
    %c0_i32_1 = arith.constant 0 : i32
    %c0_i32_2 = arith.constant 0 : i32
    return %c0_i32, %c0_i32_0, %c0_i32_1 : i32, i32, i32
  }
  func.func @transform_6(%arg0: i32) -> (i32, i32) {
    %c0_i32 = arith.constant 0 : i32
    %c0_i32_0 = arith.constant 0 : i32
    %c0_i32_1 = arith.constant 0 : i32
    return %c0_i32, %c0_i32_0 : i32, i32
  }
  func.func @transform_7(%arg0: i32) -> (i32, i32) {
    %c0_i32 = arith.constant 0 : i32
    %c0_i32_0 = arith.constant 0 : i32
    %c0_i32_1 = arith.constant 0 : i32
    return %c0_i32, %c0_i32_0 : i32, i32
  }
  func.func @transform_8(%arg0: i32) -> (i32, i32) {
    %c0_i32 = arith.constant 0 : i32
    %c0_i32_0 = arith.constant 0 : i32
    %c0_i32_1 = arith.constant 0 : i32
    return %c0_i32, %c0_i32_0 : i32, i32
  }
  func.func @transform_9(%arg0: i32) -> (i32, i32, i32) {
    %c0_i32 = arith.constant 0 : i32
    %c0_i32_0 = arith.constant 0 : i32
    %c0_i32_1 = arith.constant 0 : i32
    return %arg0, %c0_i32, %c0_i32_0 : i32, i32, i32
  }
}

</mosaic_0001>

<bundles_post_ra>
// kernel: tpu_custom_call.1
= control target key start
LH: loop header
LB: loop body
LE: loop exit
PB: predicated region body
PF: predicated region fallthrough
CT: control target
= control target key end

     0   :  { %v4239_v2 = vmov 0   ;;  %vm107_vm0 = vcmask 523264   ;;  %s5122_s0 = inlined_call_operand.vmem [shape: bf16[2,8,128], index: 0, kind: input, shape index: {}]   ;;  %s5123_s1 = inlined_call_operand.vmem [shape: bf16[2,8,64], index: 1, kind: input, shape index: {}]   ;;  %s5124_s2 = inlined_call_operand.vmem [shape: bf16[3,128,192], index: 2, kind: input, shape index: {}]   ;;  %s5125_s3 = inlined_call_operand.vmem [shape: bf16[3,64,192], index: 3, kind: input, shape index: {}]   ;;  %s5126_s4 = inlined_call_operand.vmem [shape: f32[3,1,192], index: 4, kind: input, shape index: {}]   ;;  %s5127_s5 = inlined_call_operand.vmem [shape: bf16[8,24,192], index: 5, kind: input, shape index: {}]   ;;  %s5128_s6 = inlined_call_operand.vmem [shape: f32[1,192], index: 6, kind: input, shape index: {}]   ;;  %s5129_s7 = inlined_call_operand.vmem [shape: bf16[192,128], index: 7, kind: input, shape index: {}]   ;;  %s5130_s8 = inlined_call_operand.vmem [shape: f32[1,128], index: 8, kind: input, shape index: {}]   ;;  %s5131_s9 = inlined_call_operand.hbm [shape: f32[2,8,128], index: 9, kind: output, shape index: {}]  }
   0x1   :  { %v3989_v0 = vld [vmem:[%s5125_s3 + $0x4] ss:$8 sps:$4 sm:$0xff]   ;;  %v3991_v1 = vld [vmem:[%s5125_s3] ss:$8 sps:$4 sm:$0xff]   ;;  %143 = vmatprep.mubr.bf16.mxu0 %v4239_v2  ;;  %520 = vmatprep.mubr.bf16.mxu1 %v4239_v2  ;;  %v3992_v3 = vld [vmem:[%s5125_s3 + $0x14] ss:$8 sps:$4 sm:$0xff]  }
   0x2   :  { %111 = vmatprep.subr.bf16.mxu0 %v3989_v0  ;;  %v3994_v4 = vld [vmem:[%s5125_s3 + $0x10] ss:$8 sps:$4 sm:$0xff]   ;;  %v3995_v5 = vld [vmem:[%s5125_s3 + $0x24] ss:$8 sps:$4 sm:$0xff]   ;;  %v3997_v6 = vld [vmem:[%s5125_s3 + $0x20] ss:$8 sps:$4 sm:$0xff]  }
   0x3   :  { %112 = vmatpush1.bf16.msra.mxu0 %v3991_v1  ;;  %v3998_v7 = vld [vmem:[%s5125_s3 + $0x34] ss:$8 sps:$4 sm:$0xff]   ;;  %v4000_v8 = vld [vmem:[%s5125_s3 + $0x30] ss:$8 sps:$4 sm:$0xff]   ;;  %v4003_v9 = vld [vmem:[%s5124_s2 + $0x4] ss:$8 sps:$4 sm:$0xff]  }
   0x4   :  { %113 = vmatprep.subr.bf16.mxu0 %v3992_v3  ;;  %v4014_v10 = vld [vmem:[%s5124_s2 + $0x84] ss:$8 sps:$4 sm:$0xff]   ;;  %v4016_v11 = vld [vmem:[%s5124_s2 + $0x80] ss:$8 sps:$4 sm:$0xff]   ;;  %v4020_v14 = vld [vmem:[%s5124_s2 + $0x94] ss:$8 sps:$4 sm:$0xff]  }
   0x5   :  { %v4001_v12 = vld [vmem:[%s5124_s2] ss:$8 sps:$4 sm:$0xff]   ;;  %488 = vmatprep.subr.bf16.mxu1 %v4014_v10  ;;  %v4022_v15 = vld [vmem:[%s5124_s2 + $0x90] ss:$8 sps:$4 sm:$0xff]   ;;  %v4007_v16 = vld [vmem:[%s5124_s2 + $0x14] ss:$8 sps:$4 sm:$0xff]  }
   0x6   :  { %v4342_v13 = vld [vmem:[%s5123_s1] sm:$0xff]   ;;  %489 = vmatpush1.bf16.msra.mxu1 %v4016_v11  ;;  %v4005_v18 = vld [vmem:[%s5124_s2 + $0x10] ss:$8 sps:$4 sm:$0xff]   ;;  %v4032_v21 = vld [vmem:[%s5124_s2 + $0xb4] ss:$8 sps:$4 sm:$0xff]  }
   0x7   :  { %114 = vmatpush1.bf16.msra.mxu0 %v3994_v4  ;;  %490 = vmatprep.subr.bf16.mxu1 %v4020_v14  ;;  %v4026_v17 = vld [vmem:[%s5124_s2 + $0xa4] ss:$8 sps:$4 sm:$0xff]   ;;  %v4028_v19 = vld [vmem:[%s5124_s2 + $0xa0] ss:$8 sps:$4 sm:$0xff]   ;;  %v4013_v23 = vld [vmem:[%s5124_s2 + $0x34] ss:$8 sps:$4 sm:$0xff]  }
   0x8   :  { %115 = vmatprep.subr.bf16.mxu0 %v3995_v5  ;;  %v4010_v20 = vld [vmem:[%s5124_s2 + $0x24] ss:$8 sps:$4 sm:$0xff]   ;;  %v4008_v22 = vld [vmem:[%s5124_s2 + $0x20] ss:$8 sps:$4 sm:$0xff]   ;;  %v4034_v24 = vld [vmem:[%s5124_s2 + $0xb0] ss:$8 sps:$4 sm:$0xff]  }
   0x9   :  { %v4038_v25 = vld [vmem:[%s5124_s2 + $0xc4] ss:$8 sps:$4 sm:$0xff]   ;;  %v4011_v26 = vld [vmem:[%s5124_s2 + $0x30] ss:$8 sps:$4 sm:$0xff]   ;;  %v4040_v27 = vld [vmem:[%s5124_s2 + $0xc0] ss:$8 sps:$4 sm:$0xff]  }
   0xa   :  { %491 = vmatpush1.bf16.msra.mxu1 %v4022_v15  ;;  %v4019_v28 = vld [vmem:[%s5124_s2 + $0x44] ss:$8 sps:$4 sm:$0xff]   ;;  %v4045_v29 = vld [vmem:[%s5124_s2 + $0xd4] ss:$8 sps:$4 sm:$0xff]   ;;  %v4017_v30 = vld [vmem:[%s5124_s2 + $0x40] ss:$8 sps:$4 sm:$0xff]  }
   0xb   :  { %116 = vmatpush1.bf16.msra.mxu0 %v3997_v6  ;;  %492 = vmatprep.subr.bf16.mxu1 %v4026_v17  ;;  %v4047_v31 = vld [vmem:[%s5124_s2 + $0xd0] ss:$8 sps:$4 sm:$0xff]   ;;  %v4025_v32 = vld [vmem:[%s5124_s2 + $0x54] ss:$8 sps:$4 sm:$0xff]   ;;  %v4051_v33 = vld [vmem:[%s5124_s2 + $0xe4] ss:$8 sps:$4 sm:$0xff]  }
   0xc   :  { %117 = vmatprep.subr.bf16.mxu0 %v3998_v7  ;;  %v4023_v34 = vld [vmem:[%s5124_s2 + $0x50] ss:$8 sps:$4 sm:$0xff]   ;;  %v4053_v35 = vld [vmem:[%s5124_s2 + $0xe0] ss:$8 sps:$4 sm:$0xff]   ;;  %v4031_v36 = vld [vmem:[%s5124_s2 + $0x64] ss:$8 sps:$4 sm:$0xff]  }
   0xd   :  { %v4057_v37 = vld [vmem:[%s5124_s2 + $0xf4] ss:$8 sps:$4 sm:$0xff]   ;;  %v4029_v38 = vld [vmem:[%s5124_s2 + $0x60] ss:$8 sps:$4 sm:$0xff]   ;;  %v4059_v39 = vld [vmem:[%s5124_s2 + $0xf0] ss:$8 sps:$4 sm:$0xff]  }
   0xe   :  { %493 = vmatpush1.bf16.msra.mxu1 %v4028_v19  ;;  %v4037_v40 = vld [vmem:[%s5124_s2 + $0x74] ss:$8 sps:$4 sm:$0xff]   ;;  %v4035_v41 = vld [vmem:[%s5124_s2 + $0x70] ss:$8 sps:$4 sm:$0xff]   ;;  %v4434_v42 = vld [vmem:[%s5122_s0] sm:$0xff]  }
   0xf   :  { %118 = vmatpush1.bf16.msra.mxu0 %v4000_v8  ;;  %494 = vmatprep.subr.bf16.mxu1 %v4032_v21  ;;  %v4044_v43 = vld [vmem:[%s5125_s3 + $0x44] ss:$8 sps:$4 sm:$0xff]   ;;  %v4042_v44 = vld [vmem:[%s5125_s3 + $0x40] ss:$8 sps:$4 sm:$0xff]   ;;  %v4050_v45 = vld [vmem:[%s5125_s3 + $0x54] ss:$8 sps:$4 sm:$0xff]  }
  0x10   :  { %240 = vmatprep.subr.bf16.mxu0 %v4003_v9  ;;  %v4048_v46 = vld [vmem:[%s5125_s3 + $0x50] ss:$8 sps:$4 sm:$0xff]   ;;  %v4056_v47 = vld [vmem:[%s5125_s3 + $0x64] ss:$8 sps:$4 sm:$0xff]   ;;  %v4054_v48 = vld [vmem:[%s5125_s3 + $0x60] ss:$8 sps:$4 sm:$0xff]  }
  0x12   :  { %3412 = vmatmul.mubr.msk.bf16.vlgmr.msra.gmra.mrb[0].mxu0 %vm107_vm0, %v4342_v13  ;;  %495 = vmatpush1.bf16.msra.mxu1 %v4034_v24 }
  0x13   :  { %241 = vmatpush1.bf16.msra.mxu0 %v4001_v12  ;;  %272 = vmatprep.mubr.bf16.mxu0 %v4239_v2 }
  0x14   :  { %242 = vmatprep.subr.bf16.mxu0 %v4007_v16  ;;  %496 = vmatprep.subr.bf16.mxu1 %v4038_v25 }
  0x16   :  { %497 = vmatpush1.bf16.msra.mxu1 %v4040_v27 }
  0x17   :  { %243 = vmatpush1.bf16.msra.mxu0 %v4005_v18  ;;  %498 = vmatprep.subr.bf16.mxu1 %v4045_v29 }
  0x18   :  { %244 = vmatprep.subr.bf16.mxu0 %v4010_v20 }
  0x1a   :  { %499 = vmatpush1.bf16.msra.mxu1 %v4047_v31 }
  0x1b   :  { %245 = vmatpush1.bf16.msra.mxu0 %v4008_v22  ;;  %500 = vmatprep.subr.bf16.mxu1 %v4051_v33 }
  0x1c   :  { %246 = vmatprep.subr.bf16.mxu0 %v4013_v23 }
  0x1e   :  { %501 = vmatpush1.bf16.msra.mxu1 %v4053_v35 }
  0x1f   :  { %247 = vmatpush1.bf16.msra.mxu0 %v4011_v26  ;;  %502 = vmatprep.subr.bf16.mxu1 %v4057_v37 }
  0x20   :  { %248 = vmatprep.subr.bf16.mxu0 %v4019_v28 }
  0x22   :  { %503 = vmatpush1.bf16.msra.mxu1 %v4059_v39 }
  0x23   :  { %249 = vmatpush1.bf16.msra.mxu0 %v4017_v30 }
  0x24   :  { %250 = vmatprep.subr.bf16.mxu0 %v4025_v32 }
  0x25   :  { %521 = vmatmul.mubr.bf16.vlgmr.msra.gmra.mrb[0].mxu1 %v4434_v42 }
  0x27   :  { %251 = vmatpush1.bf16.msra.mxu0 %v4023_v34 }
  0x28   :  { %252 = vmatprep.subr.bf16.mxu0 %v4031_v36 }
  0x2b   :  { %253 = vmatpush1.bf16.msra.mxu0 %v4029_v38 }
  0x2c   :  { %254 = vmatprep.subr.bf16.mxu0 %v4037_v40 }
  0x2f   :  { %255 = vmatpush1.bf16.msra.mxu0 %v4035_v41 }
  0x30   :  { %365 = vmatprep.subr.bf16.mxu0 %v4044_v43 }
  0x32   :  { %273 = vmatmul.mubr.bf16.vlgmr.msra.gmra.mrb[0].mxu0 %v4434_v42 }
  0x33   :  { %366 = vmatpush1.bf16.msra.mxu0 %v4042_v44  ;;  %397 = vmatprep.mubr.bf16.mxu0 %v4239_v2 }
  0x34   :  { %367 = vmatprep.subr.bf16.mxu0 %v4050_v45 }
  0x37   :  { %368 = vmatpush1.bf16.msra.mxu0 %v4048_v46 }
  0x38   :  { %14 = vsyncpa [#allocation3], 0  ;;  %369 = vmatprep.subr.bf16.mxu0 %v4056_v47  ;;  %v4062_v49 = vld [vmem:[%s5125_s3 + $0x74] ss:$8 sps:$4 sm:$0xff]   ;;  %v4060_v50 = vld [vmem:[%s5125_s3 + $0x70] ss:$8 sps:$4 sm:$0xff]   ;;  %v285_v52 = vlaneseq }
  0x39   :  { %v4240_v51 = vmov 0.0   ;;  %vm4241_vm1 = vmmov 0   ;;  %v283_v55 = vld [vmem:[%s5126_s4] sm:$0x3]  ;;  %v3479_v10 = vld [vmem:[%s5126_s4 + $0x2] sm:$0x3] }
  0x3a   :  { %3745 = vmatprep.subr.bf16.mxu1 %v4240_v51  ;;  %3747 = vmatprep.mubr.msk.bf16.mxu1 %vm4241_vm1, %v4240_v51  ;;  %v286_v53 = vshrl.u32 %v285_v52, 7  ;;  %vm827_vm2 = vcmask 195584   ;;  %v4063_v30 = vld [vmem:[%s5125_s3 + $0x80] ss:$8 sps:$4 sm:$0xff]   ;;  %v4065_v31 = vld [vmem:[%s5125_s3 + $0x84] ss:$8 sps:$4 sm:$0xff]  }
  0x3b   :  { %370 = vmatpush1.bf16.msra.mxu0 %v4054_v48  ;;  %v4068_v32 = vld [vmem:[%s5125_s3 + $0x94] ss:$8 sps:$4 sm:$0xff]   ;;  %v4066_v33 = vld [vmem:[%s5125_s3 + $0x90] ss:$8 sps:$4 sm:$0xff]   ;;  %v4071_v34 = vld [vmem:[%s5125_s3 + $0xa4] ss:$8 sps:$4 sm:$0xff]  }
  0x3c   :  { %371 = vmatprep.subr.bf16.mxu0 %v4062_v49  ;;  %v4469_v54 = vsub.s32 0, %v286_v53  ;;  %v4474_v56 = vsub.s32 1, %v286_v53  ;;  %v4069_v35 = vld [vmem:[%s5125_s3 + $0xa0] ss:$8 sps:$4 sm:$0xff]   ;;  %v4074_v36 = vld [vmem:[%s5125_s3 + $0xb4] ss:$8 sps:$4 sm:$0xff]  }
  0x3d   :  { %v4072_v37 = vld [vmem:[%s5125_s3 + $0xb0] ss:$8 sps:$4 sm:$0xff]   ;;  %v4077_v38 = vld [vmem:[%s5124_s2 + $0x104] ss:$8 sps:$4 sm:$0xff]   ;;  %v4075_v39 = vld [vmem:[%s5124_s2 + $0x100] ss:$8 sps:$4 sm:$0xff]  }
  0x3e   :  { %v288_v58 = vrot.slane %v283_v55, %v4469_v54  ;;  %v292_v60 = vrot.slane %v283_v55, %v4474_v56  ;;  %v537_v11 = vrot.slane %v3479_v10, %v4469_v54  ;;  %v541_v14 = vrot.slane %v3479_v10, %v4474_v56  ;;  %v4080_v40 = vld [vmem:[%s5124_s2 + $0x114] ss:$8 sps:$4 sm:$0xff]   ;;  %v4078_v41 = vld [vmem:[%s5124_s2 + $0x110] ss:$8 sps:$4 sm:$0xff]   ;;  %v4081_v43 = vld [vmem:[%s5124_s2 + $0x120] ss:$8 sps:$4 sm:$0xff]  }
  0x3f   :  { %372 = vmatpush1.bf16.msra.mxu0 %v4060_v50  ;;  %v4083_v44 = vld [vmem:[%s5124_s2 + $0x124] ss:$8 sps:$4 sm:$0xff]   ;;  %v4084_v45 = vld [vmem:[%s5124_s2 + $0x130] ss:$8 sps:$4 sm:$0xff]   ;;  %v4087_v47 = vld [vmem:[%s5124_s2 + $0x140] ss:$8 sps:$4 sm:$0xff]  }
  0x40   :  { %614 = vmatprep.subr.bf16.mxu0 %v4065_v31  ;;  %v4089_v46 = vld [vmem:[%s5124_s2 + $0x144] ss:$8 sps:$4 sm:$0xff]   ;;  %v4092_v48 = vld [vmem:[%s5124_s2 + $0x154] ss:$8 sps:$4 sm:$0xff]   ;;  %v4090_v49 = vld [vmem:[%s5124_s2 + $0x150] ss:$8 sps:$4 sm:$0xff]  }
  0x41   :  { %v4095_v50 = vld [vmem:[%s5124_s2 + $0x164] ss:$8 sps:$4 sm:$0xff]   ;;  %v4093_v52 = vld [vmem:[%s5124_s2 + $0x160] ss:$8 sps:$4 sm:$0xff]   ;;  %v4098_v53 = vld [vmem:[%s5124_s2 + $0x174] ss:$8 sps:$4 sm:$0xff]  }
  0x42   :  { %3462 = vmatmul.mubr.msk.bf16.vlgmr.msra.gmra.mrb[4].mxu0 %vm107_vm0, %v4342_v13  ;;  %v4096_v55 = vld [vmem:[%s5124_s2 + $0x170] ss:$8 sps:$4 sm:$0xff]   ;;  %vm920_vm3 = vcmask 64512   ;;  %v3529_v10 = vld [vmem:[%s5126_s4 + $0x4] sm:$0x3]  ;;  %vm948_vm4 = vcmask 1043456  }
  0x43   :  { %646 = vmatprep.mubr.bf16.mxu0 %v4239_v2  ;;  %615 = vmatpush1.bf16.msra.mxu0 %v4063_v30  ;;  %s4243_s4 = smov 80   ;;  %s4244_s26 = smov 56  }
  0x44   :  { %616 = vmatprep.subr.bf16.mxu0 %v4068_v32  ;;  %s4245_s22 = smov 32   ;;  %s4246_s3 = smov 8  }
  0x45   :  { %s4247_s0 = smov 112   ;;  %s4248_s12 = smov 88  }
  0x47   :  { %617 = vmatpush1.bf16.msra.mxu0 %v4066_v33 }
  0x48   :  { %618 = vmatprep.subr.bf16.mxu0 %v4071_v34 }
  0x4b   :  { %619 = vmatpush1.bf16.msra.mxu0 %v4069_v35 }
  0x4c   :  { %620 = vmatprep.subr.bf16.mxu0 %v4074_v36 }
  0x4f   :  { %621 = vmatpush1.bf16.msra.mxu0 %v4072_v37 }
  0x50   :  { %737 = vmatprep.subr.bf16.mxu0 %v4077_v38 }
  0x52   :  { %3512 = vmatmul.mubr.msk.bf16.vlgmr.msra.gmra.mrb[8].mxu0 %vm107_vm0, %v4342_v13  ;;  %v4086_v13 = vld [vmem:[%s5124_s2 + $0x134] ss:$8 sps:$4 sm:$0xff]   ;;  %s4242_s2 = smov 104  }
  0x53   :  { %738 = vmatpush1.bf16.msra.mxu0 %v4075_v39  ;;  %769 = vmatprep.mubr.bf16.mxu0 %v4239_v2 }
  0x54   :  { %739 = vmatprep.subr.bf16.mxu0 %v4080_v40 }
  0x57   :  { %740 = vmatpush1.bf16.msra.mxu0 %v4078_v41 }
  0x58   :  { %741 = vmatprep.subr.bf16.mxu0 %v4083_v44 }
  0x5b   :  { %742 = vmatpush1.bf16.msra.mxu0 %v4081_v43 }
  0x5c   :  { %743 = vmatprep.subr.bf16.mxu0 %v4086_v13 }
  0x5f   :  { %744 = vmatpush1.bf16.msra.mxu0 %v4084_v45 }
  0x60   :  { %745 = vmatprep.subr.bf16.mxu0 %v4089_v46 }
  0x63   :  { %746 = vmatpush1.bf16.msra.mxu0 %v4087_v47 }
  0x64   :  { %747 = vmatprep.subr.bf16.mxu0 %v4092_v48 }
  0x67   :  { %748 = vmatpush1.bf16.msra.mxu0 %v4090_v49 }
  0x68   :  { %749 = vmatprep.subr.bf16.mxu0 %v4095_v50 }
  0x6b   :  { %750 = vmatpush1.bf16.msra.mxu0 %v4093_v52 }
  0x6c   :  { %751 = vmatprep.subr.bf16.mxu0 %v4098_v53 }
  0x6f   :  { %752 = vmatpush1.bf16.msra.mxu0 %v4096_v55 }
  0x70   :  { %3781 = vmatprep.subr.bf16.mxu0 %v4240_v51 }
  0x72   :  { %770 = vmatmul.mubr.bf16.vlgmr.msra.gmra.mrb[8].mxu0 %v4434_v42 }
  0x73   :  { %3783 = vmatprep.mubr.msk.bf16.mxu0 %vm4241_vm1, %v4240_v51 }
  0xf8   :  { %v522_v57 = vpop.f32.mrb[0].mxu1 }
  0xf9   :  { %v524_v59 = vpop.f32.mrb[1].mxu1 }
  0xfa   :  { %v526_v61 = vpop.f32.mrb[2].mxu1 }
  0xfb   :  { %v528_v62 = vpop.f32.mrb[3].mxu1 }
 0x105   :  { %v274_v63 = vpop.f32.mrb[0].mxu0 }
 0x106   :  { %v4478_v0 = vadd.f32 %v288_v58, %v274_v63  ;;  %v276_v1 = vpop.f32.mrb[1].mxu0 }
 0x107   :  { %v4480_v3 = vadd.f32 %v292_v60, %v276_v1  ;;  %v278_v4 = vpop.f32.mrb[2].mxu0 }
 0x108   :  { %v4482_v5 = vadd.f32 %v288_v58, %v278_v4  ;;  %v280_v6 = vpop.f32.mrb[3].mxu0  ;;  %v4644_v40 = vpack.c.bf16 %v4478_v0, %v4478_v0 }
 0x109   :  { %v4486_v7 = vpack.c.bf16 %v4480_v3, %v4478_v0  ;;  %v4488_v8 = vadd.f32 %v292_v60, %v280_v6 }
 0x10a   :  { %v4656_v43 = vpack.c.bf16 %v4482_v5, %v4482_v5 }
 0x10b   :  { %v4492_v9 = vpack.c.bf16 %v4488_v8, %v4482_v5 }
 0x115   :  { %v399_v12 = vpop.f32.mrb[4].mxu0 }
 0x116   :  { %v523_v15 = vadd.f32 %v522_v57, %v399_v12  ;;  %v401_v16 = vpop.f32.mrb[5].mxu0  ;;  %v790_v12 = vrot.slane %v3529_v10, %v4474_v56 }
 0x117   :  { %v525_v17 = vadd.f32 %v524_v59, %v401_v16  ;;  %v403_v18 = vpop.f32.mrb[6].mxu0 }
 0x118   :  { %v4499_v19 = vadd.f32 %v537_v11, %v523_v15  ;;  %v527_v20 = vadd.f32 %v526_v61, %v403_v18  ;;  %v405_v21 = vpop.f32.mrb[7].mxu0 }
 0x119   :  { %v4501_v22 = vadd.f32 %v541_v14, %v525_v17  ;;  %v529_v23 = vadd.f32 %v528_v62, %v405_v21 }
 0x11a   :  { %v4503_v24 = vadd.f32 %v537_v11, %v527_v20  ;;  %v4612_v42 = vpack.c.bf16 %v4499_v19, %v4499_v19  ;;  %v786_v11 = vrot.slane %v3529_v10, %v4469_v54 }
 0x11b   :  { %v4507_v25 = vpack.c.bf16 %v4501_v22, %v4499_v19  ;;  %v4509_v26 = vadd.f32 %v541_v14, %v529_v23 }
 0x11c   :  { %v4650_v41 = vpack.c.bf16 %v4503_v24, %v4503_v24 }
 0x11d   :  { %v4513_v27 = vpack.c.bf16 %v4509_v26, %v4503_v24  ;;  %v832_v28 = vsel %vm827_vm2, %v4507_v25, 0 }
 0x11e   :  { %3746 = vmatpush3.bf16.xpose.msra.mxu1 %v832_v28 }
 0x11f   :  { %3751 = vmatprep.subr.bf16.mxu1 %v4240_v51  ;;  %v878_v29 = vsel %vm827_vm2, %v4513_v27, 0 }
 0x125   :  { %3748 = vmatmul.mubr.msk.bf16.vlgmr.msra.gmra.mrb[4].mxu1 %vm827_vm2, %v4486_v7 }
 0x126   :  { %3752 = vmatpush3.bf16.xpose.msra.mxu1 %v878_v29  ;;  %3753 = vmatprep.mubr.msk.bf16.mxu1 %vm4241_vm1, %v4240_v51 }
 0x127   :  { %3757 = vmatprep.subr.bf16.mxu1 %v4240_v51 }
 0x12d   :  { %3754 = vmatmul.mubr.msk.bf16.vlgmr.msra.gmra.mrb[8].mxu1 %vm827_vm2, %v4492_v9 }
 0x12e   :  { %3759 = vmatprep.mubr.msk.bf16.mxu1 %vm4241_vm1, %v4240_v51 }
 0x145   :  { %v771_v14 = vpop.f32.mrb[8].mxu0 }
 0x146   :  { %v4621_v16 = vadd.f32 %v786_v11, %v771_v14  ;;  %v773_v17 = vpop.f32.mrb[9].mxu0 }
 0x147   :  { %v4623_v19 = vadd.f32 %v790_v12, %v773_v17  ;;  %v775_v20 = vpop.f32.mrb[10].mxu0 }
 0x148   :  { %v4625_v21 = vadd.f32 %v786_v11, %v775_v20  ;;  %v777_v23 = vpop.f32.mrb[11].mxu0 }
 0x149   :  { %v4629_v29 = vpack.c.bf16 %v4623_v19, %v4621_v16  ;;  %v4631_v30 = vadd.f32 %v790_v12, %v777_v23 }
 0x14b   :  { %v4635_v31 = vpack.c.bf16 %v4631_v30, %v4625_v21  ;;  %v950_v32 = vsel %vm948_vm4, %v4629_v29, 0 }
 0x14c   :  { %3758 = vmatpush3.bf16.msra.mxu1 %v950_v32 }
 0x14d   :  { %3763 = vmatprep.subr.bf16.mxu1 %v4240_v51  ;;  %v996_v24 = vsel %vm948_vm4, %v4635_v31, 0 }
 0x1f8   :  { %v868_v57 = vpop.f32.mrb[4].mxu1 }
 0x1f9   :  { %v3749_v58 = vpop.f32.mrb[5].mxu1  ;;  %v921_v59 = vsel %vm920_vm3, %v868_v57, -inf }
 0x1fa   :  { %922 = vmax.xlane.f32.xlu0 %v921_v59  ;;  %v871_v60 = vpop.f32.mrb[6].mxu1 }
 0x1fb   :  { %v3750_v61 = vpop.f32.mrb[7].mxu1 }
 0x200   :  { %v914_v62 = vpop.f32.mrb[8].mxu1 }
 0x201   :  { %v3755_v63 = vpop.f32.mrb[9].mxu1  ;;  %v924_v1 = vsel %vm920_vm3, %v914_v62, -inf }
 0x202   :  { %925 = vmax.xlane.f32.xlu0 %v924_v1  ;;  %v917_v4 = vpop.f32.mrb[10].mxu1 }
 0x203   :  { %v3756_v6 = vpop.f32.mrb[11].mxu1 }
 0x218   :  { %1046 = vrot.lane.b32.xlu0 %v4612_v42, %s4242_s2 }
 0x287   :  { %v923_v15 = vpop.xlane.xlu0 %922 }
 0x288   :  { %v927_v18 = vsub.f32 %v868_v57, %v923_v15 }
 0x28a   :  { %v929_v28 = vmul.f32 1.442695, %v927_v18 }
 0x28c   :  { %4151 = vpow2.f32 %v929_v28  ;;  %v4688_v28 = vpack.c.bf16 %v4625_v21, %v4625_v21 }
 0x28f   :  { %v926_v33 = vpop.xlane.xlu0 %925 }
 0x290   :  { %v928_v34 = vsub.f32 %v914_v62, %v926_v33 }
 0x292   :  { %v931_v35 = vmul.f32 1.442695, %v928_v34 }
 0x293   :  { %v1047_v48 = vpop.permute.xlu0 %1046 }
 0x294   :  { %4153 = vpow2.f32 %v931_v35  ;;  %v1052_v52 = vsel %vm827_vm2, %v1047_v48, 0 }
 0x296   :  { %v4152_v36 = vpop.eup %4151 }
 0x297   :  { %v933_v37 = vsel %vm920_vm3, %v4152_v36, 0.0 }
 0x298   :  { %934 = vadd.xlane.f32.xlu1 %v933_v37 }
 0x29e   :  { %v4154_v38 = vpop.eup %4153 }
 0x29f   :  { %v936_v39 = vsel %vm920_vm3, %v4154_v38, 0.0 }
 0x2a0   :  { %937 = vadd.xlane.f32.xlu1 %v936_v39 }
 0x2b1   :  { %1043 = vrot.lane.b32.xlu1 %v4644_v40, %s4242_s2 }
 0x2b5   :  { %1098 = vrot.lane.b32.xlu1 %v4650_v41, %s4242_s2 }
 0x2b9   :  { %1095 = vrot.lane.b32.xlu1 %v4656_v43, %s4242_s2 }
 0x325   :  { %v935_v44 = vpop.xlane.xlu1 %934 }
 0x326   :  { %4155 = vrcp.f32 %v935_v44 }
 0x32d   :  { %v938_v0 = vpop.xlane.xlu1 %937 }
 0x32e   :  { %4157 = vrcp.f32 %v938_v0 }
 0x330   :  { %v4156_v13 = vpop.eup %4155 }
 0x331   :  { %v941_v45 = vmul.f32 %v4156_v13, %v4152_v36  ;;  %v1044_v50 = vpop.permute.xlu1 %1043 }
 0x333   :  { %v943_v46 = vpack.c.bf16 %v941_v45, %v941_v45 }
 0x335   :  { %3760 = vmatmul.mubr.msk.bf16.vlgmr.msra.gmra.mrb[12].mxu1 %vm920_vm3, %v943_v46  ;;  %v1099_v53 = vpop.permute.xlu1 %1098 }
 0x336   :  { %3764 = vmatpush3.bf16.msra.mxu1 %v996_v24  ;;  %3765 = vmatprep.mubr.msk.bf16.mxu1 %vm4241_vm1, %v4240_v51  ;;  %v1104_v55 = vsel %vm827_vm2, %v1099_v53, 0 }
 0x337   :  { %3769 = vmatprep.subr.bf16.mxu1 %v4240_v51 }
 0x338   :  { %v4158_v5 = vpop.eup %4157 }
 0x339   :  { %v942_v47 = vmul.f32 %v4158_v5, %v4154_v38  ;;  %v1096_v57 = vpop.permute.xlu1 %1095 }
 0x33b   :  { %v944_v49 = vpack.c.bf16 %v942_v47, %v942_v47 }
 0x33d   :  { %3766 = vmatmul.mubr.msk.bf16.vlgmr.msra.gmra.mrb[16].mxu1 %vm920_vm3, %v944_v49 }
 0x33e   :  { %3771 = vmatprep.mubr.msk.bf16.mxu1 %vm4241_vm1, %v4240_v51 }
 0x33f   :  { %3770 = vmatpush3.bf16.xpose.msra.mxu1 %v1052_v52 }
 0x340   :  { %3775 = vmatprep.subr.bf16.mxu1 %v4240_v51 }
 0x346   :  { %3772 = vmatmul.mubr.msk.bf16.vlgmr.msra.gmra.mrb[20].mxu1 %vm827_vm2, %v1044_v50 }
 0x347   :  { %3776 = vmatpush3.bf16.xpose.msra.mxu1 %v1104_v55  ;;  %3777 = vmatprep.mubr.msk.bf16.mxu1 %vm4241_vm1, %v4240_v51 }
 0x348   :  { %3787 = vmatprep.subr.bf16.mxu1 %v4240_v51 }
 0x34e   :  { %3778 = vmatmul.mubr.msk.bf16.vlgmr.msra.gmra.mrb[24].mxu1 %vm827_vm2, %v1096_v57  ;;  %v4720_v57 = vpack.c.bf16 %v4621_v16, %v4621_v16 }
 0x34f   :  { %3789 = vmatprep.mubr.msk.bf16.mxu1 %vm4241_vm1, %v4240_v51 }
 0x408   :  { %v4679_v58 = vpop.f32.mrb[12].mxu1 }
 0x409   :  { %v3761_v59 = vpop.f32.mrb[13].mxu1 }
 0x40a   :  { %v989_v60 = vpop.f32.mrb[14].mxu1 }
 0x40b   :  { %v3762_v61 = vpop.f32.mrb[15].mxu1 }
 0x410   :  { %v4681_v62 = vpop.f32.mrb[16].mxu1 }
 0x411   :  { %v1038_v63 = vpack.c.bf16 %v4681_v62, %v4679_v58  ;;  %v3767_v1 = vpop.f32.mrb[17].mxu1  ;;  %v4109_v62 = vld [vmem:[%s5127_s5 + $0x30] ss:$8 sps:$4 sm:$0xff]  }
 0x412   :  { %v1035_v4 = vpop.f32.mrb[18].mxu1 }
 0x413   :  { %v3768_v6 = vpop.f32.mrb[19].mxu1 }
 0x419   :  { %v1088_v10 = vpop.f32.mrb[20].mxu1 }
 0x41a   :  { %v3773_v11 = vpop.f32.mrb[21].mxu1  ;;  %v1146_v38 = vsel %vm920_vm3, %v1088_v10, -inf }
 0x41b   :  { %v1091_v12 = vpop.f32.mrb[22].mxu1 }
 0x41c   :  { %v3774_v14 = vpop.f32.mrb[23].mxu1 }
 0x421   :  { %v1140_v15 = vpop.f32.mrb[24].mxu1 }
 0x422   :  { %v3779_v17 = vpop.f32.mrb[25].mxu1  ;;  %v1149_v18 = vsel %vm920_vm3, %v1140_v15, -inf }
 0x423   :  { %1150 = vmax.xlane.f32.xlu0 %v1149_v18  ;;  %v1143_v20 = vpop.f32.mrb[26].mxu1 }
 0x424   :  { %v3780_v23 = vpop.f32.mrb[27].mxu1 }
 0x439   :  { %1220 = vrot.lane.b32.xlu0 %v4688_v28, %s4242_s2 }
 0x43d   :  { %1407 = vrot.lane.b32.xlu0 %v4644_v40, %s4243_s4 }
 0x441   :  { %1457 = vrot.lane.b32.xlu0 %v4656_v43, %s4243_s4 }
 0x4b0   :  { %v1151_v32 = vpop.xlane.xlu0 %1150 }
 0x4b1   :  { %v1153_v33 = vsub.f32 %v1140_v15, %v1151_v32 }
 0x4b3   :  { %v1156_v34 = vmul.f32 1.442695, %v1153_v33 }
 0x4b4   :  { %v1221_v35 = vpop.permute.xlu0 %1220 }
 0x4b5   :  { %4159 = vpow2.f32 %v1156_v34  ;;  %v1226_v36 = vsel %vm948_vm4, %v1221_v35, 0 }
 0x4b6   :  { %3788 = vmatpush3.bf16.msra.mxu1 %v1226_v36 }
 0x4b7   :  { %3793 = vmatprep.subr.bf16.mxu1 %v4240_v51 }
 0x4b8   :  { %v1408_v5 = vpop.permute.xlu0 %1407 }
 0x4bc   :  { %v1458_v48 = vpop.permute.xlu0 %1457 }
 0x4bf   :  { %v4160_v21 = vpop.eup %4159 }
 0x4c0   :  { %v1161_v37 = vsel %vm920_vm3, %v4160_v21, 0.0 }
 0x4c1   :  { %1162 = vadd.xlane.f32.xlu1 %v1161_v37  ;;  %v4099_v37 = vld [vmem:[%s5127_s5 + $0x18] ss:$8 sps:$4 sm:$0xff]  }
 0x4d2   :  { %1409 = vrot.lane.b32.xlu1 %v4612_v42, %s4243_s4 }
 0x4d6   :  { %1459 = vrot.lane.b32.xlu1 %v4650_v41, %s4243_s4 }
 0x4fa   :  { %1147 = vmax.xlane.f32.xlu1 %v1146_v38  ;;  %v4101_v38 = vld [vmem:[%s5127_s5 + $0x1c] ss:$8 sps:$4 sm:$0xff]  }
 0x54e   :  { %v1163_v39 = vpop.xlane.xlu1 %1162 }
 0x54f   :  { %4161 = vrcp.f32 %v1163_v39  ;;  %v3552_v39 = vld [vmem:[%s5127_s5 + $0x28] sm:$0xff] }
 0x552   :  { %v1410_v13 = vpop.permute.xlu1 %1409 }
 0x553   :  { %v1415_v46 = vsel %vm827_vm2, %v1410_v13, 0 }
 0x556   :  { %v1460_v24 = vpop.permute.xlu1 %1459 }
 0x557   :  { %v1465_v47 = vsel %vm827_vm2, %v1460_v24, 0 }
 0x559   :  { %v4162_v44 = vpop.eup %4161 }
 0x55a   :  { %v1167_v0 = vmul.f32 %v4162_v44, %v4160_v21  ;;  %v3556_v44 = vcombine.high %v3552_v39, %v3552_v39 }
 0x55c   :  { %v1169_v45 = vpack.c.bf16 %v1167_v0, %v1167_v0  ;;  %v3555_v0 = vcombine.low %v3552_v39, %v3552_v39 }
 0x55e   :  { %3790 = vmatmul.mubr.msk.bf16.vlgmr.msra.gmra.mrb[28].mxu1 %vm920_vm3, %v1169_v45  ;;  %v1292_v13 = vsel %vm948_vm4, %v3555_v0, 0  ;;  %v4106_v45 = vld [vmem:[%s5127_s5 + $0x4] ss:$8 sps:$4 sm:$0xff]  }
 0x55f   :  { %3794 = vmatpush3.bf16.xpose.msra.mxu1 %v1415_v46  ;;  %3795 = vmatprep.mubr.msk.bf16.mxu1 %vm4241_vm1, %v4240_v51 }
 0x560   :  { %3799 = vmatprep.subr.bf16.mxu1 %v4240_v51 }
 0x566   :  { %3796 = vmatmul.mubr.msk.bf16.vlgmr.msra.gmra.mrb[32].mxu1 %vm827_vm2, %v1408_v5 }
 0x567   :  { %3800 = vmatpush3.bf16.xpose.msra.mxu1 %v1465_v47  ;;  %3801 = vmatprep.mubr.msk.bf16.mxu1 %vm4241_vm1, %v4240_v51 }
 0x568   :  { %3811 = vmatprep.subr.bf16.mxu1 %v4240_v51 }
 0x56e   :  { %3802 = vmatmul.mubr.msk.bf16.vlgmr.msra.gmra.mrb[36].mxu1 %vm827_vm2, %v1458_v48 }
 0x56f   :  { %3813 = vmatprep.mubr.msk.bf16.mxu1 %vm4241_vm1, %v4240_v51 }
 0x587   :  { %v1148_v49 = vpop.xlane.xlu1 %1147 }
 0x588   :  { %v1152_v50 = vsub.f32 %v1088_v10, %v1148_v49 }
 0x58a   :  { %v1154_v52 = vmul.f32 1.442695, %v1152_v50 }
 0x58c   :  { %4163 = vpow2.f32 %v1154_v52 }
 0x596   :  { %v4164_v53 = vpop.eup %4163 }
 0x597   :  { %v1158_v55 = vsel %vm920_vm3, %v4164_v53, 0.0 }
 0x598   :  { %1159 = vadd.xlane.f32.xlu0 %v1158_v55 }
 0x5ae   :  { %1171 = vrot.lane.b32.xlu0 %v4720_v57, %s4242_s2 }
 0x5b2   :  { %1579 = vrot.lane.b32.xlu0 %v4688_v28, %s4243_s4 }
 0x5b6   :  { %1705 = vrot.lane.b32.xlu0 %v4612_v42, %s4244_s26 }
 0x5ba   :  { %1703 = vrot.lane.b32.xlu0 %v4644_v40, %s4244_s26 }
 0x5be   :  { %1755 = vrot.lane.b32.xlu0 %v4650_v41, %s4244_s26 }
 0x625   :  { %v1160_v59 = vpop.xlane.xlu0 %1159 }
 0x626   :  { %4165 = vrcp.f32 %v1160_v59  ;;  %v1041_v59 = vld [vmem:[%s5127_s5 + $0x10] sm:$0xff] }
 0x629   :  { %v1172_v16 = vpop.permute.xlu0 %1171 }
 0x62a   :  { %v1177_v60 = vsel %vm948_vm4, %v1172_v16, 0 }
 0x62b   :  { %3782 = vmatpush3.bf16.msra.mxu0 %v1177_v60  ;;  %v4104_v60 = vld [vmem:[%s5127_s5] ss:$8 sps:$4 sm:$0xff]  }
 0x62c   :  { %1297 = vmatprep.subr.bf16.mxu0 %v4101_v38 }
 0x62d   :  { %v1580_v61 = vpop.permute.xlu0 %1579 }
 0x62e   :  { %v1585_v1 = vsel %vm948_vm4, %v1580_v61, 0 }
 0x62f   :  { %3812 = vmatpush3.bf16.msra.mxu1 %v1585_v1 }
 0x630   :  { %v4166_v4 = vpop.eup %4165  ;;  %3817 = vmatprep.subr.bf16.mxu1 %v4240_v51 }
 0x631   :  { %v1166_v6 = vmul.f32 %v4166_v4, %v4164_v53  ;;  %v1262_v10 = vpop.f32.mrb[28].mxu1  ;;  %v3562_v4 = vcombine.high %v1041_v59, %v1041_v59 }
 0x632   :  { %v3791_v11 = vpop.f32.mrb[29].mxu1 }
 0x633   :  { %v1265_v12 = vpop.f32.mrb[30].mxu1  ;;  %v1168_v14 = vpack.c.bf16 %v1166_v6, %v1166_v6  ;;  %v3561_v6 = vcombine.low %v1041_v59, %v1041_v59 }
 0x634   :  { %v3792_v15 = vpop.f32.mrb[31].mxu1 }
 0x635   :  { %3784 = vmatmul.mubr.msk.bf16.vlgmr.msra.gmra.mrb[12].mxu0 %vm920_vm3, %v1168_v14  ;;  %v1359_v14 = vsel %vm948_vm4, %v3561_v6, 0 }
 0x636   :  { %1329 = vmatprep.mubr.bf16.mxu0 %v4239_v2  ;;  %1298 = vmatpush1.bf16.msra.mxu0 %v4099_v37  ;;  %v3571_v37 = vld [vmem:[%s5127_s5 + $0x40] sm:$0xff] }
 0x637   :  { %3557 = vmatprep.subr.msk.bf16.mxu0 %vm948_vm4, %v3556_v44  ;;  %v3575_v38 = vcombine.high %v3571_v37, %v3571_v37  ;;  %v3574_v39 = vcombine.low %v3571_v37, %v3571_v37 }
 0x639   :  { %v1451_v17 = vpop.f32.mrb[32].mxu1  ;;  %v1651_v44 = vsel %vm948_vm4, %v3574_v39, 0 }
 0x63a   :  { %v3797_v18 = vpop.f32.mrb[33].mxu1  ;;  %v1507_v20 = vsel %vm920_vm3, %v1451_v17, -inf  ;;  %1300 = vmatpush1.bf16.msra.mxu0 %v1292_v13 }
 0x63b   :  { %1508 = vmax.xlane.f32.xlu1 %v1507_v20  ;;  %v1454_v23 = vpop.f32.mrb[34].mxu1  ;;  %1364 = vmatprep.subr.bf16.mxu0 %v4106_v45  ;;  %v4111_v18 = vld [vmem:[%s5127_s5 + $0x34] ss:$8 sps:$4 sm:$0xff]  }
 0x63c   :  { %v3798_v32 = vpop.f32.mrb[35].mxu1 }
 0x641   :  { %v1501_v33 = vpop.f32.mrb[36].mxu1 }
 0x642   :  { %v3803_v34 = vpop.f32.mrb[37].mxu1  ;;  %v1510_v35 = vsel %vm920_vm3, %v1501_v33, -inf }
 0x643   :  { %1511 = vmax.xlane.f32.xlu1 %v1510_v35  ;;  %v1504_v36 = vpop.f32.mrb[38].mxu1  ;;  %v1706_v34 = vpop.permute.xlu0 %1705 }
 0x644   :  { %v3804_v21 = vpop.f32.mrb[39].mxu1  ;;  %v1711_v36 = vsel %vm827_vm2, %v1706_v34, 0 }
 0x647   :  { %v1704_v21 = vpop.permute.xlu0 %1703 }
 0x6c8   :  { %v1509_v46 = vpop.xlane.xlu1 %1508 }
 0x6c9   :  { %v1513_v24 = vsub.f32 %v1451_v17, %v1509_v46 }
 0x6cb   :  { %v1515_v5 = vmul.f32 1.442695, %v1513_v24  ;;  %v1756_v24 = vpop.permute.xlu0 %1755 }
 0x6cd   :  { %4167 = vpow2.f32 %v1515_v5 }
 0x6d0   :  { %v1512_v47 = vpop.xlane.xlu1 %1511 }
 0x6d1   :  { %v1514_v48 = vsub.f32 %v1501_v33, %v1512_v47 }
 0x6d3   :  { %v1517_v49 = vmul.f32 1.442695, %v1514_v48 }
 0x6d5   :  { %4169 = vpow2.f32 %v1517_v49 }
 0x6d7   :  { %v4168_v50 = vpop.eup %4167 }
 0x6d8   :  { %v1519_v52 = vsel %vm920_vm3, %v4168_v50, 0.0 }
 0x6d9   :  { %1520 = vadd.xlane.f32.xlu1 %v1519_v52 }
 0x6df   :  { %v4170_v53 = vpop.eup %4169 }
 0x6e0   :  { %v1522_v55 = vsel %vm920_vm3, %v4170_v53, 0.0 }
 0x6e1   :  { %1523 = vadd.xlane.f32.xlu1 %v1522_v55 }
 0x6f2   :  { %1531 = vrot.lane.b32.xlu1 %v4720_v57, %s4243_s4 }
 0x6f6   :  { %1753 = vrot.lane.b32.xlu1 %v4656_v43, %s4244_s26 }
 0x708   :  { %v1213_v16 = vpop.f32.mrb[12].mxu0 }
 0x709   :  { %v1268_v61 = vpack.c.bf16 %v1262_v10, %v1213_v16  ;;  %v3785_v1 = vpop.f32.mrb[13].mxu0 }
 0x70a   :  { %v1216_v11 = vpop.f32.mrb[14].mxu0 }
 0x70b   :  { %v3786_v12 = vpop.f32.mrb[15].mxu0  ;;  %3558 = vmatmul.mubr.msk.bf16.vlgmr.msra.gmra.mrb[16].mxu0 %vm827_vm2, %v1268_v61 }
 0x70c   :  { %1365 = vmatpush1.bf16.msra.mxu0 %v4104_v60  ;;  %1396 = vmatprep.mubr.bf16.mxu0 %v4239_v2 }
 0x70d   :  { %3563 = vmatprep.subr.msk.bf16.mxu0 %vm948_vm4, %v3562_v4 }
 0x710   :  { %1367 = vmatpush1.bf16.msra.mxu0 %v1359_v14 }
 0x711   :  { %3805 = vmatprep.subr.bf16.mxu0 %v4240_v51 }
 0x717   :  { %3564 = vmatmul.mubr.msk.bf16.vlgmr.msra.gmra.mrb[16].mxu0 %vm827_vm2, %v1038_v63 }
 0x718   :  { %3807 = vmatprep.mubr.msk.bf16.mxu0 %vm4241_vm1, %v4240_v51 }
 0x766   :  { %v1521_v10 = vpop.xlane.xlu1 %1520 }
 0x767   :  { %4171 = vrcp.f32 %v1521_v10 }
 0x76e   :  { %v1524_v15 = vpop.xlane.xlu1 %1523 }
 0x76f   :  { %4173 = vrcp.f32 %v1524_v15 }
 0x771   :  { %v4172_v17 = vpop.eup %4171 }
 0x772   :  { %v1527_v20 = vmul.f32 %v4172_v17, %v4168_v50  ;;  %v1532_v23 = vpop.permute.xlu1 %1531  ;;  %v1761_v50 = vsel %vm827_vm2, %v1756_v24, 0 }
 0x773   :  { %v1537_v32 = vsel %vm948_vm4, %v1532_v23, 0 }
 0x774   :  { %3806 = vmatpush3.bf16.msra.mxu0 %v1537_v32  ;;  %v1529_v58 = vpack.c.bf16 %v1527_v20, %v1527_v20 }
 0x775   :  { %1656 = vmatprep.subr.bf16.mxu0 %v4111_v18 }
 0x776   :  { %v1754_v16 = vpop.permute.xlu1 %1753 }
 0x777   :  { %3808 = vmatmul.mubr.msk.bf16.vlgmr.msra.gmra.mrb[20].mxu0 %vm920_vm3, %v1529_v58 }
 0x778   :  { %1657 = vmatpush1.bf16.msra.mxu0 %v4109_v62  ;;  %1688 = vmatprep.mubr.bf16.mxu0 %v4239_v2 }
 0x779   :  { %v4174_v63 = vpop.eup %4173  ;;  %3576 = vmatprep.subr.msk.bf16.mxu0 %vm948_vm4, %v3575_v38 }
 0x77a   :  { %v1528_v33 = vmul.f32 %v4174_v63, %v4170_v53 }
 0x77c   :  { %v1530_v35 = vpack.c.bf16 %v1528_v33, %v1528_v33  ;;  %1659 = vmatpush1.bf16.msra.mxu0 %v1651_v44 }
 0x77d   :  { %3823 = vmatprep.subr.bf16.mxu0 %v4240_v51 }
 0x77e   :  { %3814 = vmatmul.mubr.msk.bf16.vlgmr.msra.gmra.mrb[40].mxu1 %vm920_vm3, %v1530_v35 }
 0x77f   :  { %3818 = vmatpush3.bf16.xpose.msra.mxu1 %v1711_v36  ;;  %3819 = vmatprep.mubr.msk.bf16.mxu1 %vm4241_vm1, %v4240_v51 }
 0x780   :  { %3829 = vmatprep.subr.bf16.mxu1 %v4240_v51 }
 0x786   :  { %3820 = vmatmul.mubr.msk.bf16.vlgmr.msra.gmra.mrb[44].mxu1 %vm827_vm2, %v1704_v21 }
 0x787   :  { %3831 = vmatprep.mubr.msk.bf16.mxu1 %vm4241_vm1, %v4240_v51 }
 0x84a   :  { %v1573_v0 = vpop.f32.mrb[20].mxu0 }
 0x84b   :  { %v3809_v13 = vpop.f32.mrb[21].mxu0 }
 0x84c   :  { %v1576_v45 = vpop.f32.mrb[22].mxu0 }
 0x84d   :  { %v3810_v46 = vpop.f32.mrb[23].mxu0  ;;  %v3676_v45 = vpack.c.bf16 %v4501_v22, %v4501_v22 }
 0x851   :  { %v1621_v5 = vpop.f32.mrb[40].mxu1 }
 0x852   :  { %v1627_v47 = vpack.c.bf16 %v1621_v5, %v1573_v0  ;;  %v3815_v48 = vpop.f32.mrb[41].mxu1 }
 0x853   :  { %v1624_v49 = vpop.f32.mrb[42].mxu1 }
 0x854   :  { %v3816_v52 = vpop.f32.mrb[43].mxu1  ;;  %3577 = vmatmul.mubr.msk.bf16.vlgmr.msra.gmra.mrb[16].mxu0 %vm827_vm2, %v1627_v47 }
 0x855   :  { %3824 = vmatpush3.bf16.xpose.msra.mxu0 %v1761_v50  ;;  %3825 = vmatprep.mubr.msk.bf16.mxu0 %vm4241_vm1, %v4240_v51 }
 0x856   :  { %3835 = vmatprep.subr.bf16.mxu0 %v4240_v51 }
 0x859   :  { %v1747_v53 = vpop.f32.mrb[44].mxu1 }
 0x85a   :  { %v3821_v55 = vpop.f32.mrb[45].mxu1  ;;  %v1803_v59 = vsel %vm920_vm3, %v1747_v53, -inf }
 0x85b   :  { %1804 = vmax.xlane.f32.xlu0 %v1803_v59  ;;  %v1750_v60 = vpop.f32.mrb[46].mxu1 }
 0x85c   :  { %v3822_v61 = vpop.f32.mrb[47].mxu1  ;;  %3826 = vmatmul.mubr.msk.bf16.vlgmr.msra.gmra.mrb[24].mxu0 %vm827_vm2, %v1754_v16 }
 0x85d   :  { %3837 = vmatprep.mubr.msk.bf16.mxu0 %vm4241_vm1, %v4240_v51 }
 0x871   :  { %1827 = vrot.lane.b32.xlu0 %v4720_v57, %s4244_s26 }
 0x875   :  { %1999 = vrot.lane.b32.xlu0 %v4644_v40, %s4245_s22 }
 0x879   :  { %2049 = vrot.lane.b32.xlu0 %v4656_v43, %s4245_s22 }
 0x8e8   :  { %v1805_v1 = vpop.xlane.xlu0 %1804 }
 0x8e9   :  { %v1809_v4 = vsub.f32 %v1747_v53, %v1805_v1 }
 0x8eb   :  { %v1811_v6 = vmul.f32 1.442695, %v1809_v4 }
 0x8ec   :  { %v1828_v11 = vpop.permute.xlu0 %1827 }
 0x8ed   :  { %4175 = vpow2.f32 %v1811_v6  ;;  %v1833_v12 = vsel %vm948_vm4, %v1828_v11, 0  ;;  %v4114_v11 = vld [vmem:[%s5127_s5 + $0x48] ss:$8 sps:$4 sm:$0xff]  }
 0x8ee   :  { %3830 = vmatpush3.bf16.msra.mxu1 %v1833_v12  ;;  %v4116_v12 = vld [vmem:[%s5127_s5 + $0x4c] ss:$8 sps:$4 sm:$0xff]  }
 0x8ef   :  { %3841 = vmatprep.subr.bf16.mxu1 %v4240_v51 }
 0x8f0   :  { %v2000_v36 = vpop.permute.xlu0 %1999 }
 0x8f4   :  { %v2050_v37 = vpop.permute.xlu0 %2049 }
 0x8f7   :  { %v4176_v14 = vpop.eup %4175 }
 0x8f8   :  { %v1815_v10 = vsel %vm920_vm3, %v4176_v14, 0.0 }
 0x8f9   :  { %1816 = vadd.xlane.f32.xlu1 %v1815_v10 }
 0x90a   :  { %2001 = vrot.lane.b32.xlu1 %v4612_v42, %s4245_s22 }
 0x90e   :  { %2051 = vrot.lane.b32.xlu1 %v4650_v41, %s4245_s22 }
 0x92f   :  { %v1797_v15 = vpop.f32.mrb[24].mxu0 }
 0x930   :  { %v3827_v17 = vpop.f32.mrb[25].mxu0  ;;  %v1806_v18 = vsel %vm920_vm3, %v1797_v15, -inf }
 0x931   :  { %v1800_v20 = vpop.f32.mrb[26].mxu0 }
 0x932   :  { %v3828_v23 = vpop.f32.mrb[27].mxu0  ;;  %1807 = vmax.xlane.f32.xlu1 %v1806_v18 }
 0x986   :  { %v1817_v32 = vpop.xlane.xlu1 %1816 }
 0x987   :  { %4177 = vrcp.f32 %v1817_v32 }
 0x98a   :  { %v2002_v63 = vpop.permute.xlu1 %2001 }
 0x98b   :  { %v2007_v34 = vsel %vm827_vm2, %v2002_v63, 0 }
 0x98e   :  { %v2052_v35 = vpop.permute.xlu1 %2051 }
 0x98f   :  { %v2057_v21 = vsel %vm827_vm2, %v2052_v35, 0 }
 0x991   :  { %v4178_v58 = vpop.eup %4177 }
 0x992   :  { %v1823_v62 = vmul.f32 %v4178_v58, %v4176_v14  ;;  %v3584_v14 = vld [vmem:[%s5127_s5 + $0x58] sm:$0xff] }
 0x993   :  { %v3588_v10 = vcombine.high %v3584_v14, %v3584_v14 }
 0x994   :  { %v1825_v33 = vpack.c.bf16 %v1823_v62, %v1823_v62 }
 0x996   :  { %3832 = vmatmul.mubr.msk.bf16.vlgmr.msra.gmra.mrb[48].mxu1 %vm920_vm3, %v1825_v33 }
 0x997   :  { %3842 = vmatpush3.bf16.xpose.msra.mxu1 %v2007_v34  ;;  %3843 = vmatprep.mubr.msk.bf16.mxu1 %vm4241_vm1, %v4240_v51 }
 0x998   :  { %3847 = vmatprep.subr.bf16.mxu1 %v4240_v51 }
 0x99e   :  { %3844 = vmatmul.mubr.msk.bf16.vlgmr.msra.gmra.mrb[52].mxu1 %vm827_vm2, %v2000_v36  ;;  %v3675_v36 = vpack.c.bf16 %v4480_v3, %v4480_v3 }
 0x99f   :  { %3848 = vmatpush3.bf16.xpose.msra.mxu1 %v2057_v21  ;;  %3849 = vmatprep.mubr.msk.bf16.mxu1 %vm4241_vm1, %v4240_v51  ;;  %v3678_v21 = vpack.c.bf16 %v4509_v26, %v4509_v26 }
 0x9a0   :  { %3859 = vmatprep.subr.bf16.mxu1 %v4240_v51 }
 0x9a6   :  { %3850 = vmatmul.mubr.msk.bf16.vlgmr.msra.gmra.mrb[56].mxu1 %vm827_vm2, %v2050_v37  ;;  %v3677_v37 = vpack.c.bf16 %v4488_v8, %v4488_v8 }
 0x9a7   :  { %3861 = vmatprep.mubr.msk.bf16.mxu1 %vm4241_vm1, %v4240_v51 }
 0x9bf   :  { %v1808_v38 = vpop.xlane.xlu1 %1807 }
 0x9c0   :  { %v1810_v39 = vsub.f32 %v1797_v15, %v1808_v38  ;;  %v3587_v15 = vcombine.low %v3584_v14, %v3584_v14  ;;  %v3679_v38 = vpack.c.bf16 %v4623_v19, %v4623_v19  ;;  %v4121_v19 = vld [vmem:[%s5127_s5 + $0x64] ss:$8 sps:$4 sm:$0xff]  }
 0x9c2   :  { %v1813_v44 = vmul.f32 1.442695, %v1810_v39  ;;  %v1947_v17 = vsel %vm948_vm4, %v3587_v15, 0 }
 0x9c4   :  { %4179 = vpow2.f32 %v1813_v44 }
 0x9ce   :  { %v4180_v0 = vpop.eup %4179 }
 0x9cf   :  { %v1818_v13 = vsel %vm920_vm3, %v4180_v0, 0.0 }
 0x9d0   :  { %1819 = vadd.xlane.f32.xlu0 %v1818_v13 }
 0x9e6   :  { %1875 = vrot.lane.b32.xlu0 %v4688_v28, %s4244_s26 }
 0x9ea   :  { %2171 = vrot.lane.b32.xlu0 %v4688_v28, %s4245_s22 }
 0x9ee   :  { %2303 = vrot.lane.b32.xlu0 %v4612_v42, %s4246_s3 }
 0x9f2   :  { %2305 = vrot.lane.b32.xlu0 %v3676_v45, %s4246_s3 }
 0x9f6   :  { %2296 = vrot.lane.b32.xlu0 %v4644_v40, %s4246_s3 }
 0x9fa   :  { %2361 = vrot.lane.b32.xlu0 %v4650_v41, %s4246_s3 }
 0x9fe   :  { %2355 = vrot.lane.b32.xlu0 %v4656_v43, %s4246_s3 }
 0xa5d   :  { %v1820_v46 = vpop.xlane.xlu0 %1819 }
 0xa5e   :  { %4181 = vrcp.f32 %v1820_v46 }
 0xa61   :  { %v1876_v24 = vpop.permute.xlu0 %1875 }
 0xa62   :  { %v1881_v5 = vsel %vm948_vm4, %v1876_v24, 0 }
 0xa63   :  { %3836 = vmatpush3.bf16.msra.mxu0 %v1881_v5 }
 0xa64   :  { %1952 = vmatprep.subr.bf16.mxu0 %v4116_v12 }
 0xa65   :  { %v2172_v42 = vpop.permute.xlu0 %2171 }
 0xa66   :  { %v2177_v22 = vsel %vm948_vm4, %v2172_v42, 0 }
 0xa67   :  { %3860 = vmatpush3.bf16.msra.mxu1 %v2177_v22 }
 0xa68   :  { %v4182_v47 = vpop.eup %4181  ;;  %3865 = vmatprep.subr.bf16.mxu1 %v4240_v51 }
 0xa69   :  { %v1824_v40 = vmul.f32 %v4182_v47, %v4180_v0  ;;  %v1869_v48 = vpop.f32.mrb[48].mxu1  ;;  %v2304_v46 = vpop.permute.xlu0 %2303  ;;  %v4119_v47 = vld [vmem:[%s5127_s5 + $0x60] ss:$8 sps:$4 sm:$0xff]  }
 0xa6a   :  { %v3833_v49 = vpop.f32.mrb[49].mxu1 }
 0xa6b   :  { %v1872_v41 = vpop.f32.mrb[50].mxu1  ;;  %v1826_v50 = vpack.c.bf16 %v1824_v40, %v1824_v40 }
 0xa6c   :  { %v3834_v52 = vpop.f32.mrb[51].mxu1 }
 0xa6d   :  { %3838 = vmatmul.mubr.msk.bf16.vlgmr.msra.gmra.mrb[28].mxu0 %vm920_vm3, %v1826_v50  ;;  %v2306_v40 = vpop.permute.xlu0 %2305 }
 0xa6e   :  { %1984 = vmatprep.mubr.bf16.mxu0 %v4239_v2  ;;  %1953 = vmatpush1.bf16.msra.mxu0 %v4114_v11  ;;  %v2307_v41 = vsel %vm920_vm3, %v2304_v46, %v2306_v40 }
 0xa6f   :  { %3589 = vmatprep.subr.msk.bf16.mxu0 %vm948_vm4, %v3588_v10  ;;  %v2312_v52 = vsel %vm827_vm2, %v2307_v41, 0 }
 0xa71   :  { %v2043_v43 = vpop.f32.mrb[52].mxu1 }
 0xa72   :  { %v3845_v53 = vpop.f32.mrb[53].mxu1  ;;  %v2099_v55 = vsel %vm920_vm3, %v2043_v43, -inf  ;;  %1955 = vmatpush1.bf16.msra.mxu0 %v1947_v17 }
 0xa73   :  { %2100 = vmax.xlane.f32.xlu1 %v2099_v55  ;;  %v2046_v59 = vpop.f32.mrb[54].mxu1  ;;  %3853 = vmatprep.subr.bf16.mxu0 %v4240_v51  ;;  %v2297_v53 = vpop.permute.xlu0 %2296 }
 0xa74   :  { %v3846_v16 = vpop.f32.mrb[55].mxu1  ;;  %v3597_v59 = vld [vmem:[%s5127_s5 + $0x70] sm:$0xff] }
 0xa75   :  { %v3601_v16 = vcombine.high %v3597_v59, %v3597_v59 }
 0xa77   :  { %v2362_v14 = vpop.permute.xlu0 %2361 }
 0xa79   :  { %v2093_v60 = vpop.f32.mrb[56].mxu1 }
 0xa7a   :  { %v3851_v61 = vpop.f32.mrb[57].mxu1  ;;  %v2102_v1 = vsel %vm920_vm3, %v2093_v60, -inf }
 0xa7b   :  { %2103 = vmax.xlane.f32.xlu1 %v2102_v1  ;;  %v2096_v4 = vpop.f32.mrb[58].mxu1 }
 0xa7c   :  { %v3852_v6 = vpop.f32.mrb[59].mxu1 }
 0xb00   :  { %v2101_v18 = vpop.xlane.xlu1 %2100 }
 0xb01   :  { %v2105_v20 = vsub.f32 %v2043_v43, %v2101_v18 }
 0xb03   :  { %v2107_v23 = vmul.f32 1.442695, %v2105_v20 }
 0xb05   :  { %4183 = vpow2.f32 %v2107_v23 }
 0xb08   :  { %v2104_v32 = vpop.xlane.xlu1 %2103 }
 0xb09   :  { %v2106_v58 = vsub.f32 %v2093_v60, %v2104_v32  ;;  %v3600_v60 = vcombine.low %v3597_v59, %v3597_v59 }
 0xb0b   :  { %v2109_v62 = vmul.f32 1.442695, %v2106_v58  ;;  %v2243_v61 = vsel %vm948_vm4, %v3600_v60, 0 }
 0xb0d   :  { %4185 = vpow2.f32 %v2109_v62 }
 0xb0f   :  { %v4184_v63 = vpop.eup %4183 }
 0xb10   :  { %v2111_v33 = vsel %vm920_vm3, %v4184_v63, 0.0 }
 0xb11   :  { %2112 = vadd.xlane.f32.xlu1 %v2111_v33 }
 0xb17   :  { %v4186_v34 = vpop.eup %4185 }
 0xb18   :  { %v2114_v35 = vsel %vm920_vm3, %v4186_v34, 0.0 }
 0xb19   :  { %2115 = vadd.xlane.f32.xlu1 %v2114_v35 }
 0xb2a   :  { %2123 = vrot.lane.b32.xlu1 %v4720_v57, %s4245_s22 }
 0xb2e   :  { %2298 = vrot.lane.b32.xlu1 %v3675_v36, %s4246_s3 }
 0xb32   :  { %2363 = vrot.lane.b32.xlu1 %v3678_v21, %s4246_s3 }
 0xb36   :  { %2357 = vrot.lane.b32.xlu1 %v3677_v37, %s4246_s3 }
 0xb3a   :  { %2439 = vrot.lane.b32.xlu1 %v3679_v38, %s4246_s3 }
 0xb40   :  { %v1917_v39 = vpop.f32.mrb[28].mxu0 }
 0xb41   :  { %v1923_v44 = vpack.c.bf16 %v1917_v39, %v1869_v48  ;;  %v3839_v3 = vpop.f32.mrb[29].mxu0 }
 0xb42   :  { %v1920_v0 = vpop.f32.mrb[30].mxu0 }
 0xb43   :  { %v3840_v13 = vpop.f32.mrb[31].mxu0  ;;  %3590 = vmatmul.mubr.msk.bf16.vlgmr.msra.gmra.mrb[16].mxu0 %vm827_vm2, %v1923_v44 }
 0xb44   :  { %3855 = vmatprep.mubr.msk.bf16.mxu0 %vm4241_vm1, %v4240_v51 }
 0xb9e   :  { %v2113_v26 = vpop.xlane.xlu1 %2112 }
 0xb9f   :  { %4187 = vrcp.f32 %v2113_v26 }
 0xba6   :  { %v2116_v8 = vpop.xlane.xlu1 %2115 }
 0xba7   :  { %4189 = vrcp.f32 %v2116_v8 }
 0xba9   :  { %v4188_v45 = vpop.eup %4187 }
 0xbaa   :  { %v2119_v24 = vmul.f32 %v4188_v45, %v4184_v63  ;;  %v2124_v5 = vpop.permute.xlu1 %2123  ;;  %v2356_v63 = vpop.permute.xlu0 %2355 }
 0xbab   :  { %v2129_v42 = vsel %vm948_vm4, %v2124_v5, 0 }
 0xbac   :  { %3854 = vmatpush3.bf16.msra.mxu0 %v2129_v42  ;;  %v2121_v22 = vpack.c.bf16 %v2119_v24, %v2119_v24 }
 0xbad   :  { %2248 = vmatprep.subr.bf16.mxu0 %v4121_v19 }
 0xbae   :  { %v2299_v43 = vpop.permute.xlu1 %2298 }
 0xbaf   :  { %3856 = vmatmul.mubr.msk.bf16.vlgmr.msra.gmra.mrb[32].mxu0 %vm920_vm3, %v2121_v22  ;;  %v2301_v55 = vsel %vm920_vm3, %v2297_v53, %v2299_v43 }
 0xbb0   :  { %2249 = vmatpush1.bf16.msra.mxu0 %v4119_v47  ;;  %2280 = vmatprep.mubr.bf16.mxu0 %v4239_v2 }
 0xbb1   :  { %v4190_v48 = vpop.eup %4189  ;;  %3602 = vmatprep.subr.msk.bf16.mxu0 %vm948_vm4, %v3601_v16 }
 0xbb2   :  { %v2120_v49 = vmul.f32 %v4190_v48, %v4186_v34  ;;  %v2364_v12 = vpop.permute.xlu1 %2363 }
 0xbb3   :  { %v2365_v10 = vsel %vm920_vm3, %v2362_v14, %v2364_v12 }
 0xbb4   :  { %v2122_v50 = vpack.c.bf16 %v2120_v49, %v2120_v49  ;;  %2251 = vmatpush1.bf16.msra.mxu0 %v2243_v61  ;;  %v2370_v23 = vsel %vm827_vm2, %v2365_v10, 0 }
 0xbb5   :  { %3871 = vmatprep.subr.bf16.mxu0 %v4240_v51 }
 0xbb6   :  { %3862 = vmatmul.mubr.msk.bf16.vlgmr.msra.gmra.mrb[60].mxu1 %vm920_vm3, %v2122_v50  ;;  %v2358_v58 = vpop.permute.xlu1 %2357 }
 0xbb7   :  { %3866 = vmatpush3.bf16.xpose.msra.mxu1 %v2312_v52  ;;  %3867 = vmatprep.mubr.msk.bf16.mxu1 %vm4241_vm1, %v4240_v51  ;;  %v2359_v35 = vsel %vm920_vm3, %v2356_v63, %v2358_v58 }
 0xbb8   :  { %3877 = vmatprep.subr.bf16.mxu1 %v4240_v51 }
 0xbba   :  { %v2440_v44 = vpop.permute.xlu1 %2439 }
 0xbbe   :  { %3868 = vmatmul.mubr.msk.bf16.vlgmr.msra.gmra.mrb[64].mxu1 %vm827_vm2, %v2301_v55 }
 0xbbf   :  { %3879 = vmatprep.mubr.msk.bf16.mxu1 %vm4241_vm1, %v4240_v51 }
 0xc82   :  { %v2165_v1 = vpop.f32.mrb[32].mxu0 }
 0xc83   :  { %v3857_v4 = vpop.f32.mrb[33].mxu0 }
 0xc84   :  { %v2168_v6 = vpop.f32.mrb[34].mxu0  ;;  %v3680_v4 = vpack.c.bf16 %v4631_v30, %v4631_v30 }
 0xc85   :  { %v3858_v11 = vpop.f32.mrb[35].mxu0 }
 0xc89   :  { %v2213_v15 = vpop.f32.mrb[60].mxu1 }
 0xc8a   :  { %v2219_v17 = vpack.c.bf16 %v2213_v15, %v2165_v1  ;;  %v3863_v18 = vpop.f32.mrb[61].mxu1 }
 0xc8b   :  { %v2216_v20 = vpop.f32.mrb[62].mxu1 }
 0xc8c   :  { %v3864_v32 = vpop.f32.mrb[63].mxu1  ;;  %3603 = vmatmul.mubr.msk.bf16.vlgmr.msra.gmra.mrb[16].mxu0 %vm827_vm2, %v2219_v17 }
 0xc8d   :  { %3872 = vmatpush3.bf16.xpose.msra.mxu0 %v2370_v23  ;;  %3873 = vmatprep.mubr.msk.bf16.mxu0 %vm4241_vm1, %v4240_v51 }
 0xc8e   :  { %3883 = vmatprep.subr.bf16.mxu0 %v4240_v51 }
 0xc91   :  { %v2348_v62 = vpop.f32.mrb[64].mxu1 }
 0xc92   :  { %v3869_v33 = vpop.f32.mrb[65].mxu1  ;;  %v2412_v34 = vsel %vm920_vm3, %v2348_v62, -inf }
 0xc93   :  { %2413 = vmax.xlane.f32.xlu0 %v2412_v34  ;;  %v2351_v36 = vpop.f32.mrb[66].mxu1 }
 0xc94   :  { %v3870_v21 = vpop.f32.mrb[67].mxu1  ;;  %3874 = vmatmul.mubr.msk.bf16.vlgmr.msra.gmra.mrb[36].mxu0 %vm827_vm2, %v2359_v35 }
 0xc95   :  { %3885 = vmatprep.mubr.msk.bf16.mxu0 %vm4241_vm1, %v4240_v51 }
 0xca9   :  { %2437 = vrot.lane.b32.xlu0 %v4720_v57, %s4246_s3 }
 0xcad   :  { %2619 = vrot.lane.b32.xlu0 %v4507_v25, %s4247_s0 }
 0xcb1   :  { %2671 = vrot.lane.b32.xlu0 %v4513_v27, %s4247_s0 }
 0xd20   :  { %v2414_v37 = vpop.xlane.xlu0 %2413 }
 0xd21   :  { %v2418_v38 = vsub.f32 %v2348_v62, %v2414_v37 }
 0xd23   :  { %v2420_v39 = vmul.f32 1.442695, %v2418_v38 }
 0xd24   :  { %v2438_v3 = vpop.permute.xlu0 %2437 }
 0xd25   :  { %4191 = vpow2.f32 %v2420_v39  ;;  %v2441_v0 = vsel %vm920_vm3, %v2438_v3, %v2440_v44  ;;  %v4124_v39 = vld [vmem:[%s5127_s5 + $0x78] ss:$8 sps:$4 sm:$0xff]   ;;  %v4126_v44 = vld [vmem:[%s5127_s5 + $0x7c] ss:$8 sps:$4 sm:$0xff]   ;;  %v3616_v3 = vld [vmem:[%s5127_s5 + $0x88] sm:$0xff] }
 0xd26   :  { %v2446_v13 = vsel %vm948_vm4, %v2441_v0, 0  ;;  %v3620_v0 = vcombine.high %v3616_v3, %v3616_v3 }
 0xd27   :  { %3878 = vmatpush3.bf16.msra.mxu1 %v2446_v13 }
 0xd28   :  { %3889 = vmatprep.subr.bf16.mxu1 %v4240_v51  ;;  %v2620_v42 = vpop.permute.xlu0 %2619 }
 0xd29   :  { %v2621_v47 = vrot.slane %v2620_v42, 4 }
 0xd2b   :  { %v2626_v49 = vsel %vm827_vm2, %v2621_v47, 0 }
 0xd2c   :  { %v2672_v41 = vpop.permute.xlu0 %2671 }
 0xd2f   :  { %v4192_v57 = vpop.eup %4191 }
 0xd30   :  { %v2424_v26 = vsel %vm920_vm3, %v4192_v57, 0.0 }
 0xd31   :  { %2425 = vadd.xlane.f32.xlu1 %v2424_v26 }
 0xd42   :  { %2616 = vrot.lane.b32.xlu1 %v4486_v7, %s4247_s0 }
 0xd46   :  { %2668 = vrot.lane.b32.xlu1 %v4492_v9, %s4247_s0 }
 0xd67   :  { %v2406_v8 = vpop.f32.mrb[36].mxu0 }
 0xd68   :  { %v3875_v45 = vpop.f32.mrb[37].mxu0  ;;  %v2415_v19 = vsel %vm920_vm3, %v2406_v8, -inf }
 0xd69   :  { %v2409_v46 = vpop.f32.mrb[38].mxu0  ;;  %2416 = vmax.xlane.f32.xlu0 %v2415_v19 }
 0xd6a   :  { %v3876_v24 = vpop.f32.mrb[39].mxu0 }
 0xd7f   :  { %2489 = vrot.lane.b32.xlu0 %v4688_v28, %s4246_s3  ;;  %v2673_v28 = vrot.slane %v2672_v41, 4 }
 0xd81   :  { %v2678_v43 = vsel %vm827_vm2, %v2673_v28, 0 }
 0xdbe   :  { %v2426_v5 = vpop.xlane.xlu1 %2425 }
 0xdbf   :  { %4193 = vrcp.f32 %v2426_v5 }
 0xdc2   :  { %v2617_v50 = vpop.permute.xlu1 %2616 }
 0xdc3   :  { %v2618_v52 = vrot.slane %v2617_v50, 4 }
 0xdc6   :  { %v2669_v53 = vpop.permute.xlu1 %2668 }
 0xdc7   :  { %v2670_v55 = vrot.slane %v2669_v53, 4 }
 0xdc9   :  { %v4194_v22 = vpop.eup %4193 }
 0xdca   :  { %v2432_v40 = vmul.f32 %v4194_v22, %v4192_v57 }
 0xdcc   :  { %v2434_v48 = vpack.c.bf16 %v2432_v40, %v2432_v40 }
 0xdce   :  { %3880 = vmatmul.mubr.msk.bf16.vlgmr.msra.gmra.mrb[68].mxu1 %vm920_vm3, %v2434_v48 }
 0xdcf   :  { %3890 = vmatpush3.bf16.xpose.msra.mxu1 %v2626_v49  ;;  %3891 = vmatprep.mubr.msk.bf16.mxu1 %vm4241_vm1, %v4240_v51 }
 0xdd0   :  { %3895 = vmatprep.subr.bf16.mxu1 %v4240_v51 }
 0xdd6   :  { %3892 = vmatmul.mubr.msk.bf16.vlgmr.msra.gmra.mrb[72].mxu1 %vm827_vm2, %v2618_v52 }
 0xdd7   :  { %3896 = vmatpush3.bf16.xpose.msra.mxu1 %v2678_v43  ;;  %3897 = vmatprep.mubr.msk.bf16.mxu1 %vm4241_vm1, %v4240_v51 }
 0xdd8   :  { %3907 = vmatprep.subr.bf16.mxu1 %v4240_v51 }
 0xdde   :  { %3898 = vmatmul.mubr.msk.bf16.vlgmr.msra.gmra.mrb[76].mxu1 %vm827_vm2, %v2670_v55 }
 0xddf   :  { %3909 = vmatprep.mubr.msk.bf16.mxu1 %vm4241_vm1, %v4240_v51 }
 0xdf6   :  { %v2417_v59 = vpop.xlane.xlu0 %2416 }
 0xdf7   :  { %v2419_v16 = vsub.f32 %v2406_v8, %v2417_v59 }
 0xdf9   :  { %v2422_v60 = vmul.f32 1.442695, %v2419_v16  ;;  %v3629_v16 = vld [vmem:[%s5127_s5 + $0xa0] sm:$0xff] }
 0xdfa   :  { %v2490_v11 = vpop.permute.xlu0 %2489 }
 0xdfb   :  { %4195 = vpow2.f32 %v2422_v60 }
 0xe05   :  { %v4196_v61 = vpop.eup %4195 }
 0xe06   :  { %v2427_v1 = vsel %vm920_vm3, %v4196_v61, 0.0 }
 0xe07   :  { %2428 = vadd.xlane.f32.xlu1 %v2427_v1 }
 0xe18   :  { %2491 = vrot.lane.b32.xlu1 %v3680_v4, %s4246_s3 }
 0xe94   :  { %v2429_v6 = vpop.xlane.xlu1 %2428 }
 0xe95   :  { %4197 = vrcp.f32 %v2429_v6  ;;  %v3633_v6 = vcombine.high %v3629_v16, %v3629_v16 }
 0xe98   :  { %v2492_v12 = vpop.permute.xlu1 %2491 }
 0xe99   :  { %v2493_v14 = vsel %vm920_vm3, %v2490_v11, %v2492_v12  ;;  %v3632_v11 = vcombine.low %v3629_v16, %v3629_v16 }
 0xe9a   :  { %v2498_v10 = vsel %vm948_vm4, %v2493_v14, 0 }
 0xe9b   :  { %3884 = vmatpush3.bf16.msra.mxu0 %v2498_v10 }
 0xe9c   :  { %2569 = vmatprep.subr.bf16.mxu0 %v4126_v44 }
 0xe9f   :  { %v4198_v15 = vpop.eup %4197 }
 0xea0   :  { %v2433_v17 = vmul.f32 %v4198_v15, %v4196_v61  ;;  %v4129_v61 = vld [vmem:[%s5127_s5 + $0x90] ss:$8 sps:$4 sm:$0xff]   ;;  %v2866_v15 = vsel %vm948_vm4, %v3632_v11, 0 }
 0xea1   :  { %v2482_v18 = vpop.f32.mrb[68].mxu1 }
 0xea2   :  { %v3881_v20 = vpop.f32.mrb[69].mxu1  ;;  %v2435_v23 = vpack.c.bf16 %v2433_v17, %v2433_v17 }
 0xea3   :  { %v2485_v32 = vpop.f32.mrb[70].mxu1 }
 0xea4   :  { %v3882_v58 = vpop.f32.mrb[71].mxu1  ;;  %3886 = vmatmul.mubr.msk.bf16.vlgmr.msra.gmra.mrb[40].mxu0 %vm920_vm3, %v2435_v23 }
 0xea5   :  { %2601 = vmatprep.mubr.bf16.mxu0 %v4239_v2  ;;  %2570 = vmatpush1.bf16.msra.mxu0 %v4124_v39 }
 0xea6   :  { %3621 = vmatprep.subr.msk.bf16.mxu0 %vm948_vm4, %v3620_v0 }
 0xea9   :  { %v2662_v30 = vpop.f32.mrb[72].mxu1 }
 0xeaa   :  { %v3893_v62 = vpop.f32.mrb[73].mxu1  ;;  %v2720_v63 = vsel %vm920_vm3, %v2662_v30, -inf }
 0xeab   :  { %2721 = vmax.xlane.f32.xlu0 %v2720_v63  ;;  %v2665_v33 = vpop.f32.mrb[74].mxu1 }
 0xeac   :  { %v3894_v34 = vpop.f32.mrb[75].mxu1 }
 0xeb1   :  { %v2714_v35 = vpop.f32.mrb[76].mxu1 }
 0xeb2   :  { %v3899_v36 = vpop.f32.mrb[77].mxu1  ;;  %v2723_v21 = vsel %vm920_vm3, %v2714_v35, -inf }
 0xeb3   :  { %2724 = vmax.xlane.f32.xlu1 %v2723_v21  ;;  %v2717_v37 = vpop.f32.mrb[78].mxu1 }
 0xeb4   :  { %v3900_v38 = vpop.f32.mrb[79].mxu1 }
 0xec4   :  { %2793 = vrot.lane.b32.xlu1 %v4635_v31, %s4247_s0 }
 0xec8   :  { %2921 = vrot.lane.b32.xlu1 %v4507_v25, %s4248_s12  ;;  %v3619_v25 = vcombine.low %v3616_v3, %v3616_v3 }
 0xecc   :  { %2973 = vrot.lane.b32.xlu1 %v4513_v27, %s4248_s12 }
 0xed0   :  { %2970 = vrot.lane.b32.xlu1 %v4492_v9, %s4248_s12  ;;  %v2564_v9 = vsel %vm948_vm4, %v3619_v25, 0 }
 0xed1   :  { %2572 = vmatpush1.bf16.msra.mxu0 %v2564_v9 }
 0xed2   :  { %3901 = vmatprep.subr.bf16.mxu0 %v4240_v51 }
 0xf38   :  { %v2722_v27 = vpop.xlane.xlu0 %2721 }
 0xf39   :  { %v2726_v13 = vsub.f32 %v2662_v30, %v2722_v27 }
 0xf3b   :  { %v2728_v57 = vmul.f32 1.442695, %v2726_v13 }
 0xf3d   :  { %4199 = vpow2.f32 %v2728_v57 }
 0xf40   :  { %v2725_v26 = vpop.xlane.xlu1 %2724 }
 0xf41   :  { %v2727_v8 = vsub.f32 %v2714_v35, %v2725_v26 }
 0xf43   :  { %v2730_v45 = vmul.f32 1.442695, %v2727_v8 }
 0xf44   :  { %v2794_v19 = vpop.permute.xlu1 %2793 }
 0xf45   :  { %4201 = vpow2.f32 %v2730_v45  ;;  %v2795_v46 = vrot.slane %v2794_v19, 4 }
 0xf47   :  { %v4200_v24 = vpop.eup %4199  ;;  %v2800_v5 = vsel %vm948_vm4, %v2795_v46, 0 }
 0xf48   :  { %3908 = vmatpush3.bf16.msra.mxu1 %v2800_v5  ;;  %v2732_v42 = vsel %vm920_vm3, %v4200_v24, 0.0  ;;  %v2922_v1 = vpop.permute.xlu1 %2921 }
 0xf49   :  { %2733 = vadd.xlane.f32.xlu0 %v2732_v42  ;;  %3913 = vmatprep.subr.bf16.mxu1 %v4240_v51  ;;  %v2923_v14 = vrot.slane %v2922_v1, 4  ;;  %v4134_v1 = vld [vmem:[%s5127_s5 + $0xa8] ss:$8 sps:$4 sm:$0xff]  }
 0xf4c   :  { %v2974_v58 = vpop.permute.xlu1 %2973 }
 0xf4d   :  { %v2975_v33 = vrot.slane %v2974_v58, 4  ;;  %v4147_v58 = vld [vmem:[%s5129_s7 + $0x40] sm:$0xff]  }
 0xf4f   :  { %v4202_v22 = vpop.eup %4201  ;;  %v2980_v37 = vsel %vm827_vm2, %v2975_v33, 0 }
 0xf50   :  { %v2735_v47 = vsel %vm920_vm3, %v4202_v22, 0.0  ;;  %v2971_v39 = vpop.permute.xlu1 %2970 }
 0xf51   :  { %2736 = vadd.xlane.f32.xlu0 %v2735_v47  ;;  %v2972_v3 = vrot.slane %v2971_v39, 4  ;;  %v4149_v39 = vld [vmem:[%s5129_s7 + $0x50] sm:$0xff]  }
 0xf67   :  { %2744 = vrot.lane.b32.xlu0 %v4629_v29, %s4247_s0 }
 0xf6b   :  { %2918 = vrot.lane.b32.xlu0 %v4486_v7, %s4248_s12  ;;  %v4131_v7 = vld [vmem:[%s5127_s5 + $0x94] ss:$8 sps:$4 sm:$0xff]  }
 0xf77   :  { %v2534_v40 = vpop.f32.mrb[40].mxu0 }
 0xf78   :  { %v2540_v48 = vpack.c.bf16 %v2534_v40, %v2482_v18  ;;  %v3887_v49 = vpop.f32.mrb[41].mxu0  ;;  %v2928_v18 = vsel %vm827_vm2, %v2923_v14, 0  ;;  %v4139_v14 = vld [vmem:[%s5129_s7] sm:$0xff]  }
 0xf79   :  { %v2537_v41 = vpop.f32.mrb[42].mxu0 }
 0xf7a   :  { %v3888_v50 = vpop.f32.mrb[43].mxu0  ;;  %3622 = vmatmul.mubr.msk.bf16.vlgmr.msra.gmra.mrb[16].mxu0 %vm827_vm2, %v2540_v48 }
 0xf7b   :  { %3903 = vmatprep.mubr.msk.bf16.mxu0 %vm4241_vm1, %v4240_v51 }
 0xfd6   :  { %v2734_v28 = vpop.xlane.xlu0 %2733 }
 0xfd7   :  { %4203 = vrcp.f32 %v2734_v28 }
 0xfde   :  { %v2737_v52 = vpop.xlane.xlu0 %2736 }
 0xfdf   :  { %4205 = vrcp.f32 %v2737_v52 }
 0xfe1   :  { %v4204_v43 = vpop.eup %4203 }
 0xfe2   :  { %v2745_v53 = vpop.permute.xlu0 %2744  ;;  %v2740_v55 = vmul.f32 %v4204_v43, %v4200_v24 }
 0xfe3   :  { %v2746_v59 = vrot.slane %v2745_v53, 4 }
 0xfe4   :  { %v2742_v4 = vpack.c.bf16 %v2740_v55, %v2740_v55 }
 0xfe5   :  { %v2751_v60 = vsel %vm948_vm4, %v2746_v59, 0 }
 0xfe6   :  { %3902 = vmatpush3.bf16.msra.mxu0 %v2751_v60  ;;  %v2919_v20 = vpop.permute.xlu0 %2918 }
 0xfe7   :  { %2871 = vmatprep.subr.bf16.mxu0 %v4131_v7  ;;  %v2920_v23 = vrot.slane %v2919_v20, 4  ;;  %v4144_v20 = vld [vmem:[%s5129_s7 + $0x28] sm:$0xff]  }
 0xfe9   :  { %v4206_v12 = vpop.eup %4205  ;;  %3904 = vmatmul.mubr.msk.bf16.vlgmr.msra.gmra.mrb[44].mxu0 %vm920_vm3, %v2742_v4  ;;  %v3642_v4 = vld [vmem:[%s5127_s5 + $0xb8] sm:$0xff] }
 0xfea   :  { %v2741_v10 = vmul.f32 %v4206_v12, %v4202_v22  ;;  %2872 = vmatpush1.bf16.msra.mxu0 %v4129_v61  ;;  %2903 = vmatprep.mubr.bf16.mxu0 %v4239_v2  ;;  %v3645_v11 = vcombine.low %v3642_v4, %v3642_v4 }
 0xfeb   :  { %3634 = vmatprep.subr.msk.bf16.mxu0 %vm948_vm4, %v3633_v6  ;;  %v3646_v6 = vcombine.high %v3642_v4, %v3642_v4 }
 0xfec   :  { %v2743_v17 = vpack.c.bf16 %v2741_v10, %v2741_v10  ;;  %v3168_v12 = vsel %vm948_vm4, %v3645_v11, 0  ;;  %v4140_v10 = vld [vmem:[%s5129_s7 + $0x8] sm:$0xff]  }
 0xfee   :  { %3910 = vmatmul.mubr.msk.bf16.vlgmr.msra.gmra.mrb[80].mxu1 %vm920_vm3, %v2743_v17  ;;  %2874 = vmatpush1.bf16.msra.mxu0 %v2866_v15  ;;  %v4141_v15 = vld [vmem:[%s5129_s7 + $0x10] sm:$0xff]   ;;  %v4142_v17 = vld [vmem:[%s5129_s7 + $0x18] sm:$0xff]  }
 0xfef   :  { %3914 = vmatpush3.bf16.xpose.msra.mxu1 %v2928_v18  ;;  %3915 = vmatprep.mubr.msk.bf16.mxu1 %vm4241_vm1, %v4240_v51  ;;  %v4143_v18 = vld [vmem:[%s5129_s7 + $0x20] sm:$0xff]  }
 0xff0   :  { %3919 = vmatprep.subr.bf16.mxu0 %v4240_v51  ;;  %3925 = vmatprep.subr.bf16.mxu1 %v4240_v51 }
 0xff6   :  { %3916 = vmatmul.mubr.msk.bf16.vlgmr.msra.gmra.mrb[84].mxu1 %vm827_vm2, %v2920_v23  ;;  %v4145_v23 = vld [vmem:[%s5129_s7 + $0x30] sm:$0xff]  }
 0xff7   :  { %3927 = vmatprep.mubr.msk.bf16.mxu1 %vm4241_vm1, %v4240_v51 }
0x10bc   :  { %v2787_v32 = vpop.f32.mrb[44].mxu0 }
0x10bd   :  { %v3905_v30 = vpop.f32.mrb[45].mxu0 }
0x10be   :  { %v2790_v62 = vpop.f32.mrb[46].mxu0  ;;  %v4148_v30 = vld [vmem:[%s5129_s7 + $0x48] sm:$0xff]  }
0x10bf   :  { %v3906_v63 = vpop.f32.mrb[47].mxu0 }
0x10c1   :  { %v2836_v34 = vpop.f32.mrb[80].mxu1 }
0x10c2   :  { %v2842_v35 = vpack.c.bf16 %v2836_v34, %v2787_v32  ;;  %v3911_v36 = vpop.f32.mrb[81].mxu1  ;;  %v4146_v32 = vld [vmem:[%s5129_s7 + $0x38] sm:$0xff]  }
0x10c3   :  { %v2839_v21 = vpop.f32.mrb[82].mxu1 }
0x10c4   :  { %v3912_v38 = vpop.f32.mrb[83].mxu1  ;;  %3635 = vmatmul.mubr.msk.bf16.vlgmr.msra.gmra.mrb[16].mxu0 %vm827_vm2, %v2842_v35 }
0x10c5   :  { %3920 = vmatpush3.bf16.xpose.msra.mxu0 %v2980_v37  ;;  %3921 = vmatprep.mubr.msk.bf16.mxu0 %vm4241_vm1, %v4240_v51 }
0x10c6   :  { %3931 = vmatprep.subr.bf16.mxu0 %v4240_v51 }
0x10c9   :  { %v2964_v44 = vpop.f32.mrb[84].mxu1 }
0x10ca   :  { %v3917_v0 = vpop.f32.mrb[85].mxu1  ;;  %v3022_v25 = vsel %vm920_vm3, %v2964_v44, -inf }
0x10cb   :  { %3023 = vmax.xlane.f32.xlu0 %v3022_v25  ;;  %v2967_v9 = vpop.f32.mrb[86].mxu1 }
0x10cc   :  { %v3918_v27 = vpop.f32.mrb[87].mxu1  ;;  %3922 = vmatmul.mubr.msk.bf16.vlgmr.msra.gmra.mrb[48].mxu0 %vm827_vm2, %v2972_v3  ;;  %v3220_v3 = vld [vmem:[%s5128_s6] sm:$0x3]  ;;  %s4249_s6 = smov [#allocation2]  }
0x10cd   :  { %3933 = vmatprep.mubr.msk.bf16.mxu0 %vm4241_vm1, %v4240_v51  ;;  %v3225_v0 = vrot.slane %v3220_v3, %v4469_v54  ;;  %v3229_v9 = vrot.slane %v3220_v3, %v4474_v56  ;;  %s3392_s29 = sshll.u32 %s4249_s6, 4  ;;  %s3393_s29 = int_to_ptr.vmem [resolvable:$true] %s3392_s29 }
0x10ce   :  { %s4215_s30 = scalar_lea.vmem %s3393_s29, 256  ;;  %p4220_p1 = scmp.lt.s32.totalorder %s3393_s29, %s3393_s29 }
0x10cf   :  { %p4216_p0 = scmp.ne.s32.totalorder %s3393_s29, %s4215_s30  ;;  %p4221_p2 = scmp.lt.s32.totalorder %s4215_s30, %s4215_s30 }
0x10d1   :  { %p4222_p3 = por %p4221_p2, %p4220_p1 }
0x10d3   :  { %p4223_p4 = pnand %p4222_p3, %p4216_p0 }
0x1158   :  { %v3024_v13 = vpop.xlane.xlu0 %3023 }
0x1159   :  { %v3028_v57 = vsub.f32 %v2964_v44, %v3024_v13  ;;  %v4150_v44 = vld [vmem:[%s5129_s7 + $0x58] sm:$0xff]  }
0x115b   :  { %v3030_v26 = vmul.f32 1.442695, %v3028_v57 }
0x115d   :  { %4207 = vpow2.f32 %v3030_v26 }
0x1167   :  { %v4208_v8 = vpop.eup %4207 }
0x1168   :  { %v3034_v45 = vsel %vm920_vm3, %v4208_v8, 0.0 }
0x1169   :  { %3035 = vadd.xlane.f32.xlu0 %v3034_v45 }
0x119f   :  { %v3016_v19 = vpop.f32.mrb[48].mxu0 }
0x11a0   :  { %v3923_v46 = vpop.f32.mrb[49].mxu0  ;;  %v3025_v24 = vsel %vm920_vm3, %v3016_v19, -inf }
0x11a1   :  { %3026 = vmax.xlane.f32.xlu1 %v3025_v24  ;;  %v3019_v5 = vpop.f32.mrb[50].mxu0  ;;  %v3649_v24 = vld [vmem:[%s5130_s8] ss:$0 sm:$0xff] }
0x11a2   :  { %v3924_v42 = vpop.f32.mrb[51].mxu0 }
0x11b2   :  { %3095 = vrot.lane.b32.xlu1 %v4635_v31, %s4248_s12 }
0x11f6   :  { %v3036_v28 = vpop.xlane.xlu0 %3035 }
0x122e   :  { %v3027_v22 = vpop.xlane.xlu1 %3026 }
0x122f   :  { %v3029_v51 = vsub.f32 %v3016_v19, %v3027_v22 }
0x1231   :  { %v3032_v47 = vmul.f32 1.442695, %v3029_v51 }
0x1232   :  { %v3096_v40 = vpop.permute.xlu1 %3095 }
0x1233   :  { %4209 = vpow2.f32 %v3032_v47  ;;  %v3097_v48 = vrot.slane %v3096_v40, 4 }
0x1234   :  { %4211 = vrcp.f32 %v3036_v28 }
0x1235   :  { %v3102_v49 = vsel %vm948_vm4, %v3097_v48, 0 }
0x1236   :  { %3932 = vmatpush3.bf16.msra.mxu0 %v3102_v49 }
0x123d   :  { %v4210_v41 = vpop.eup %4209 }
0x123e   :  { %v3037_v50 = vsel %vm920_vm3, %v4210_v41, 0.0  ;;  %v4212_v31 = vpop.eup %4211 }
0x123f   :  { %3038 = vadd.xlane.f32.xlu0 %v3037_v50  ;;  %v3042_v53 = vmul.f32 %v4212_v31, %v4208_v8 }
0x1241   :  { %v3044_v7 = vpack.c.bf16 %v3042_v53, %v3042_v53 }
0x1255   :  { %3046 = vrot.lane.b32.xlu0 %v4629_v29, %s4248_s12  ;;  %v4136_v29 = vld [vmem:[%s5127_s5 + $0xac] ss:$8 sps:$4 sm:$0xff]  }
0x1256   :  { %3173 = vmatprep.subr.bf16.mxu0 %v4136_v29 }
0x12cc   :  { %v3039_v52 = vpop.xlane.xlu0 %3038 }
0x12cd   :  { %4213 = vrcp.f32 %v3039_v52 }
0x12d0   :  { %v3047_v43 = vpop.permute.xlu0 %3046 }
0x12d1   :  { %v3048_v55 = vrot.slane %v3047_v43, 4 }
0x12d3   :  { %v3053_v59 = vsel %vm948_vm4, %v3048_v55, 0 }
0x12d4   :  { %3926 = vmatpush3.bf16.msra.mxu1 %v3053_v59 }
0x12d5   :  { %3344 = vmatprep.subr.bf16.mxu1 %v4239_v2 }
0x12d7   :  { %v4214_v16 = vpop.eup %4213  ;;  %3928 = vmatmul.mubr.msk.bf16.vlgmr.msra.gmra.mrb[88].mxu1 %vm920_vm3, %v3044_v7 }
0x12d8   :  { %v3043_v60 = vmul.f32 %v4214_v16, %v4210_v41  ;;  %3345 = vmatpush1.bf16.msra.mxu1 %v4139_v14 }
0x12d9   :  { %3346 = vmatprep.subr.bf16.mxu1 %v4239_v2 }
0x12da   :  { %v3045_v61 = vpack.c.bf16 %v3043_v60, %v3043_v60 }
0x12dc   :  { %3934 = vmatmul.mubr.msk.bf16.vlgmr.msra.gmra.mrb[52].mxu0 %vm920_vm3, %v3045_v61  ;;  %3347 = vmatpush1.bf16.msra.mxu1 %v4140_v10 }
0x12dd   :  { %3205 = vmatprep.mubr.bf16.mxu0 %v4239_v2  ;;  %3174 = vmatpush1.bf16.msra.mxu0 %v4134_v1 }
0x12de   :  { %3647 = vmatprep.subr.msk.bf16.mxu0 %vm948_vm4, %v3646_v6  ;;  %3348 = vmatprep.subr.bf16.mxu1 %v4239_v2 }
0x12e0   :  { %3349 = vmatpush1.bf16.msra.mxu1 %v4141_v15 }
0x12e1   :  { %3176 = vmatpush1.bf16.msra.mxu0 %v3168_v12  ;;  %3350 = vmatprep.subr.bf16.mxu1 %v4239_v2 }
0x12e4   :  { %3351 = vmatpush1.bf16.msra.mxu1 %v4142_v17 }
0x12e5   :  { %3352 = vmatprep.subr.bf16.mxu1 %v4239_v2 }
0x12e8   :  { %3353 = vmatpush1.bf16.msra.mxu1 %v4143_v18 }
0x12e9   :  { %3354 = vmatprep.subr.bf16.mxu1 %v4239_v2 }
0x12ec   :  { %3355 = vmatpush1.bf16.msra.mxu1 %v4144_v20 }
0x12ed   :  { %3356 = vmatprep.subr.bf16.mxu1 %v4239_v2 }
0x12f0   :  { %3357 = vmatpush1.bf16.msra.mxu1 %v4145_v23 }
0x12f1   :  { %3358 = vmatprep.subr.bf16.mxu1 %v4239_v2 }
0x12f4   :  { %3359 = vmatpush1.bf16.msra.mxu1 %v4146_v32 }
0x12f5   :  { %3360 = vmatprep.subr.bf16.mxu1 %v4239_v2 }
0x12f8   :  { %3361 = vmatpush1.bf16.msra.mxu1 %v4147_v58 }
0x12f9   :  { %3362 = vmatprep.subr.bf16.mxu1 %v4239_v2 }
0x12fc   :  { %3363 = vmatpush1.bf16.msra.mxu1 %v4148_v30 }
0x12fd   :  { %3364 = vmatprep.subr.bf16.mxu1 %v4239_v2 }
0x1300   :  { %3365 = vmatpush1.bf16.msra.mxu1 %v4149_v39 }
0x1301   :  { %3366 = vmatprep.subr.bf16.mxu1 %v4239_v2 }
0x1304   :  { %3367 = vmatpush1.bf16.msra.mxu1 %v4150_v44 }
0x13aa   :  { %v3089_v62 = vpop.f32.mrb[88].mxu1 }
0x13ab   :  { %v3929_v63 = vpop.f32.mrb[89].mxu1 }
0x13ac   :  { %v3092_v33 = vpop.f32.mrb[90].mxu1 }
0x13ad   :  { %v3930_v34 = vpop.f32.mrb[91].mxu1 }
0x13af   :  { %v3138_v35 = vpop.f32.mrb[52].mxu0 }
0x13b0   :  { %v3144_v36 = vpack.c.bf16 %v3138_v35, %v3089_v62  ;;  %v3935_v21 = vpop.f32.mrb[53].mxu0 }
0x13b1   :  { %v3141_v37 = vpop.f32.mrb[54].mxu0 }
0x13b2   :  { %v3936_v38 = vpop.f32.mrb[55].mxu0  ;;  %3648 = vmatmul.mubr.msk.bf16.vlgmr.msra.gmra.mrb[16].mxu0 %vm827_vm2, %v3144_v36 }
0x1485   :  { %v3207_v25 = vpop.f32.mrb[16].mxu0 }
0x1486   :  { %v3209_v27 = vpop.f32.mrb[17].mxu0  ;;  %v3232_v57 = vadd.f32 %v3225_v0, %v3207_v25 }
0x1487   :  { %v3211_v13 = vpop.f32.mrb[18].mxu0  ;;  %v3233_v2 = vadd.f32 %v3229_v9, %v3209_v27 }
0x1488   :  { %v3234_v26 = vadd.f32 %v3225_v0, %v3211_v13  ;;  %v3213_v8 = vpop.f32.mrb[19].mxu0 }
0x1489   :  { %v3235_v45 = vadd.f32 %v3229_v9, %v3213_v8 }
0x148a   :  { %v3236_v19 = vpack.c.bf16 %v3234_v26, %v3232_v57 }
0x148b   :  { %v3237_v46 = vpack.c.bf16 %v3235_v45, %v3233_v2 }
0x148d   :  { %3662 = vmatprep.mubr.msk.bf16.mxu1 %vm107_vm0, %v3237_v46 }
0x148e   :  { %3377 = vmatmul.mubr.bf16.vlgmr.msra.gmra.mrb[92].mxu1 %v3236_v19 }
0x1561   :  { %v3378_v54 = vpop.f32.mrb[92].mxu1 }
0x1562   :  { %v3379_v56 = vadd.f32 %v3649_v24, %v3378_v54  ;;  %v3380_v5 = vpop.f32.mrb[93].mxu1 }
0x1563   :  { %v3381_v42 = vpop.f32.mrb[94].mxu1 }
0x1564   :  { %3385 = vst [vmem:[#allocation2] sm:$0xff] %v3379_v56  ;;  %v3382_v22 = vadd.f32 %v3649_v24, %v3381_v42  ;;  %v3383_v51 = vpop.f32.mrb[95].mxu1 }
0x1566   :  { %3386 = vst [vmem:[#allocation2 + $0x8] sm:$0xff] %v3382_v22 }
0x1567   :  { %4226 = shalt.err (!%p4223_p4)
}
0x1568   :  { %s4227_s5 = scalar_lea.hbm %s5131_s9, 256 }
0x1569   :  { %p4228_p5 = scmp.ne.s32.totalorder %s5131_s9, %s4227_s5  ;;  %p4231_p6 = scmp.lt.u32.totalorder %s4227_s5, %s5131_s9 }
0x156b   :  { %p4233_p7 = pnand %p4231_p6, %p4228_p5 }
0x156d   :  { %4236 = shalt.err (!%p4233_p7)
}
0x156e   :  { %s4250_s14 = smov 128  }
0x156f   :  { %3398 = dma.vmem_to_hbm [thread:$0]  %s3393_s29, 256, %s5131_s9, [#allocation3], %s4250_s14, %s4250_s14, %s4246_s3  }
0x1570   :  { %4237 = dma.done.wait [#allocation3], 256  }
0x1571   :  { %4238 = vsyncadd [#allocation3], 4294967040 }
0x1572   :  { %3402 = vsyncpa [#allocation3], 1 }

</bundles_post_ra>
